<compile_context>
chip_gen: v6e
topology: v6e:2x2x1
jax: 0.10.0
libtpu: 0.0.40
codegen_flags: <defaults>
</compile_context>

<pallas_src>
import numpy as np
import jax
import jax.numpy as jnp
from jax.experimental import pallas as pl
from jax.experimental.pallas import tpu as pltpu


# ----------------------------------------------------------------------------
# Positional encoding (numpy, identical to the PyTorch helper)
# ----------------------------------------------------------------------------
def get_angles(pos, i, d_model):
    angle_rates = 1 / np.power(10000, 2 * (i // 2) / np.float32(d_model))
    return pos * angle_rates


def positional_encoding(position, d_model):
    angle_rads = get_angles(np.arange(position)[:, np.newaxis],
                            np.arange(d_model)[np.newaxis, :], d_model)
    sines = np.sin(angle_rads[:, 0::2])
    cones = np.cos(angle_rads[:, 1::2])
    pos_encoding = np.concatenate([sines, cones], axis=-1)[np.newaxis, ...]
    return jnp.asarray(pos_encoding, dtype=jnp.float32)


# ----------------------------------------------------------------------------
# Fused TransformerBlock kernel (one batch element per grid step, all heads)
# ----------------------------------------------------------------------------
def make_block_kernel(heads, head_dim, eps=1e-5):
    def kernel(v_ref, k_ref, q_ref, pos_d_ref, pos_p_ref,
               wq_ref, wk_ref, wv_ref, wfc_ref, bfc_ref,
               g1_ref, be1_ref, w1_ref, bf1_ref, w2_ref, bf2_ref,
               g2_ref, be2_ref, out_ref, attn_ref):
        # Positional-encoding add fused in (dropout == identity at inference).
        v = v_ref[0] + pos_d_ref[0]          # (Sk, E)
        k = k_ref[0] + pos_d_ref[0]          # (Sk, E)
        q = q_ref[0] + pos_p_ref[0]          # (Sq, E)

        # Per-head Q/K/V projections as single lane-dense (E,E) matmuls.
        # Weights are pre-transposed, block-diagonalized, and 1/sqrt(E) is
        # already folded into wq in the wrapper.
        qp = jnp.dot(q, wq_ref[...], preferred_element_type=jnp.float32)
        kp = jnp.dot(k, wk_ref[...], preferred_element_type=jnp.float32)
        vp = jnp.dot(v, wv_ref[...], preferred_element_type=jnp.float32)

        head_outs = []
        for h in range(heads):               # static unrolled loop, heads is tiny
            lo = h * head_dim
            hi = lo + head_dim
            qh = qp[:, lo:hi]                # (Sq, D)
            kh = kp[:, lo:hi]                # (Sk, D)
            vh = vp[:, lo:hi]                # (Sk, D)
            # Contract the last axes of both operands -> no materialized k.T.
            e = jax.lax.dot_general(qh, kh, (((1,), (1,)), ((), ())),
                                    preferred_element_type=jnp.float32)  # (Sq,Sk)
            m = jnp.max(e, axis=-1, keepdims=True)
            p = jnp.exp(e - m)
            attn = p / jnp.sum(p, axis=-1, keepdims=True)   # exact softmax
            attn_ref[0, h] = attn
            head_outs.append(jnp.dot(attn, vh,
                                     preferred_element_type=jnp.float32))
        concat = jnp.concatenate(head_outs, axis=-1)          # (Sq, E)

        # fc_out (weights pre-transposed in the wrapper)
        attn_out = (jnp.dot(concat, wfc_ref[...],
                            preferred_element_type=jnp.float32) + bfc_ref[...])

        def layer_norm(x, g, b):
            mu = jnp.mean(x, axis=-1, keepdims=True)
            var = jnp.mean(jnp.square(x - mu), axis=-1, keepdims=True)
            return (x - mu) * jax.lax.rsqrt(var + eps) * g + b

        # residual + norm1   (residual is the pos-embedded query, as in torch)
        x = layer_norm(attn_out + q, g1_ref[...], be1_ref[...])

        # feed-forward: Linear -> ReLU -> Linear
        h1 = jnp.maximum(
            jnp.dot(x, w1_ref[...], preferred_element_type=jnp.float32)
            + bf1_ref[...], 0.0)
        ff = (jnp.dot(h1, w2_ref[...], preferred_element_type=jnp.float32)
              + bf2_ref[...])

        # residual + norm2
        out_ref[0] = layer_norm(ff + x, g2_ref[...], be2_ref[...])

    return kernel


def transformer_block_pallas(v, k, q, pos_d, pos_p, lp, heads):
    """v/k: (N, Sk, E) raw inputs; q: (N, Sq, E); pos_*: (1, S*, E)."""
    N, Sk, E = v.shape
    Sq = q.shape[1]
    head_dim = E // heads
    hidden = lp["w1"].shape[0]
    inv_scale = 1.0 / (float(E) ** 0.5)

    eye = jnp.eye(heads, dtype=jnp.float32)
    # Block-diagonal per-head projection matrices (x @ BD == per-head x_h @ W.T),
    # with the softmax scale folded into the Q weights.
    wq_bd = jnp.kron(eye, lp["wq"].T) * inv_scale
    wk_bd = jnp.kron(eye, lp["wk"].T)
    wv_bd = jnp.kron(eye, lp["wv"].T)
    wfc_t = lp["w_fc"].T                      # (E, E)
    w1_t = lp["w1"].T                         # (E, hidden)
    w2_t = lp["w2"].T                         # (hidden, E)
    row = lambda a: a.reshape(1, -1)

    out, attn = pl.pallas_call(
        make_block_kernel(heads, head_dim),
        out_shape=(
            jax.ShapeDtypeStruct((N, Sq, E), jnp.float32),
            jax.ShapeDtypeStruct((N, heads, Sq, Sk), jnp.float32),
        ),
        grid_spec=pltpu.PrefetchScalarGridSpec(
            num_scalar_prefetch=0,
            grid=(N,),
            in_specs=[
                pl.BlockSpec((1, Sk, E), lambda n: (n, 0, 0)),      # v
                pl.BlockSpec((1, Sk, E), lambda n: (n, 0, 0)),      # k
                pl.BlockSpec((1, Sq, E), lambda n: (n, 0, 0)),      # q
                pl.BlockSpec((1, Sk, E), lambda n: (0, 0, 0)),      # pos_drug
                pl.BlockSpec((1, Sq, E), lambda n: (0, 0, 0)),      # pos_prot
                pl.BlockSpec((E, E), lambda n: (0, 0)),             # wq_bd
                pl.BlockSpec((E, E), lambda n: (0, 0)),             # wk_bd
                pl.BlockSpec((E, E), lambda n: (0, 0)),             # wv_bd
                pl.BlockSpec((E, E), lambda n: (0, 0)),             # wfc_t
                pl.BlockSpec((1, E), lambda n: (0, 0)),             # b_fc
                pl.BlockSpec((1, E), lambda n: (0, 0)),             # gamma1
                pl.BlockSpec((1, E), lambda n: (0, 0)),             # beta1
                pl.BlockSpec((E, hidden), lambda n: (0, 0)),        # w1_t
                pl.BlockSpec((1, hidden), lambda n: (0, 0)),        # b1
                pl.BlockSpec((hidden, E), lambda n: (0, 0)),        # w2_t
                pl.BlockSpec((1, E), lambda n: (0, 0)),             # b2
                pl.BlockSpec((1, E), lambda n: (0, 0)),             # gamma2
                pl.BlockSpec((1, E), lambda n: (0, 0)),             # beta2
            ],
            out_specs=[
                pl.BlockSpec((1, Sq, E), lambda n: (n, 0, 0)),
                pl.BlockSpec((1, heads, Sq, Sk), lambda n: (n, 0, 0, 0)),
            ],
        ),
        compiler_params=pltpu.CompilerParams(
            dimension_semantics=("parallel",)),
    )(v, k, q, pos_d, pos_p,
      wq_bd, wk_bd, wv_bd, wfc_t, row(lp["b_fc"]),
      row(lp["g1"]), row(lp["be1"]),
      w1_t, row(lp["bf1"]), w2_t, row(lp["bf2"]),
      row(lp["g2"]), row(lp["be2"]))
    return out, attn


def encoder_pallas(x_drug_v, x_drug_k, x_protein_q, mask, layers,
                   pos_drug, pos_prot, heads):
    del mask  # the reference SelfAttention.forward never reads the mask
    # The reference Encoder feeds the same pos-embedded (v,k,q) into every
    # layer and overwrites out/attention each iteration -> only the last
    # layer's result is observable, so compute exactly that.
    # TODO(synk): dropout is treated as identity (inference mode).
    Sd = x_drug_v.shape[1]
    Sp = x_protein_q.shape[1]
    pos_d = pos_drug[:, :Sd, :]
    pos_p = pos_prot[:, :Sp, :]
    return transformer_block_pallas(x_drug_v, x_drug_k, x_protein_q,
                                    pos_d, pos_p, layers[-1], heads)


# ----------------------------------------------------------------------------
# Pure-JAX reference mirroring the PyTorch forward
# ----------------------------------------------------------------------------
def _self_attention_ref(values, keys_, queries, lp, heads, embed_size):
    N, q_len, _ = queries.shape
    k_len, v_len = keys_.shape[1], values.shape[1]
    hd = embed_size // heads
    v = values.reshape(N, v_len, heads, hd) @ lp["wv"].T
    k = keys_.reshape(N, k_len, heads, hd) @ lp["wk"].T
    q = queries.reshape(N, q_len, heads, hd) @ lp["wq"].T
    energy = jnp.einsum('nqhd,nkhd->nhqk', q, k)
    attention = jax.nn.softmax(energy / embed_size ** 0.5, axis=3)
    out = jnp.einsum('nhql,nlhd->nqhd', attention, v).reshape(N, q_len, embed_size)
    return out @ lp["w_fc"].T + lp["b_fc"], attention


def _layer_norm_ref(x, g, b, eps=1e-5):
    mu = x.mean(-1, keepdims=True)
    var = ((x - mu) ** 2).mean(-1, keepdims=True)
    return (x - mu) / jnp.sqrt(var + eps) * g + b


def _transformer_block_ref(v, k, q, lp, heads, embed_size):
    out, attention = _self_attention_ref(v, k, q, lp, heads, embed_size)
    x = _layer_norm_ref(out + q, lp["g1"], lp["be1"])
    h1 = jnp.maximum(x @ lp["w1"].T + lp["bf1"], 0.0)
    ff = h1 @ lp["w2"].T + lp["bf2"]
    return _layer_norm_ref(ff + x, lp["g2"], lp["be2"]), attention


def encoder_ref(x_v, x_k, x_q, layers, pos_drug, pos_prot, heads, embed_size):
    Sd, Sp = x_v.shape[1], x_q.shape[1]
    ov = x_v + pos_drug[:, :Sd, :]
    ok = x_k + pos_drug[:, :Sd, :]
    oq = x_q + pos_prot[:, :Sp, :]
    out = attention = None
    for lp in layers:
        out, attention = _transformer_block_ref(ov, ok, oq, lp, heads, embed_size)
    return out, attention


# ----------------------------------------------------------------------------
if __name__ == "__main__":
    # embed_size must be 128: the reference adds a d_model=128 positional
    # encoding directly onto the inputs.
    N = 2
    heads = 2
    embed_size = 128
    head_dim = embed_size // heads
    forward_expansion = 2
    hidden = forward_expansion * embed_size
    num_layers = 2
    seq_drug = 8        # value / key length
    seq_prot = 16       # query length
    max_length = 64

    pos_prot = positional_encoding(max_length, 128)   # (1, max_length, 128)
    pos_drug = positional_encoding(100, 128)          # (1, 100, 128)

    key = jax.random.PRNGKey(0)
    k_inputs, k_layers = jax.random.split(key)
    ki = jax.random.split(k_inputs, 3)
    x_drug_v = jax.random.normal(ki[0], (N, seq_drug, embed_size), jnp.float32)
    x_drug_k = jax.random.normal(ki[1], (N, seq_drug, embed_size), jnp.float32)
    x_prot_q = jax.random.normal(ki[2], (N, seq_prot, embed_size), jnp.float32)

    def init_layer(k):
        ks = jax.random.split(k, 13)
        s = 0.1
        return dict(
            wq=jax.random.normal(ks[0], (head_dim, head_dim), jnp.float32) * s,
            wk=jax.random.normal(ks[1], (head_dim, head_dim), jnp.float32) * s,
            wv=jax.random.normal(ks[2], (head_dim, head_dim), jnp.float32) * s,
            w_fc=jax.random.normal(ks[3], (embed_size, embed_size), jnp.float32) * s,
            b_fc=jax.random.normal(ks[4], (embed_size,), jnp.float32) * s,
            g1=1.0 + 0.1 * jax.random.normal(ks[5], (embed_size,), jnp.float32),
            be1=0.1 * jax.random.normal(ks[6], (embed_size,), jnp.float32),
            w1=jax.random.normal(ks[7], (hidden, embed_size), jnp.float32) * s,
            bf1=jax.random.normal(ks[8], (hidden,), jnp.float32) * s,
            w2=jax.random.normal(ks[9], (embed_size, hidden), jnp.float32) * s,
            bf2=jax.random.normal(ks[10], (embed_size,), jnp.float32) * s,
            g2=1.0 + 0.1 * jax.random.normal(ks[11], (embed_size,), jnp.float32),
            be2=0.1 * jax.random.normal(ks[12], (embed_size,), jnp.float32),
        )

    layers = [init_layer(k) for k in jax.random.split(k_layers, num_layers)]

    out, attn = encoder_pallas(x_drug_v, x_drug_k, x_prot_q, None, layers,
                               pos_drug, pos_prot, heads)
    out = jax.block_until_ready(out)
    attn = jax.block_until_ready(attn)

    out_ref, attn_ref = encoder_ref(x_drug_v, x_drug_k, x_prot_q, layers,
                                    pos_drug, pos_prot, heads, embed_size)
    assert jnp.allclose(out, out_ref, atol=2e-3, rtol=2e-3), "output mismatch"
    assert jnp.allclose(attn, attn_ref, atol=2e-3, rtol=2e-3), "attention mismatch"
    print("KERNEL_OK")
</pallas_src>

<mosaic_0001>
module attributes {stable_mosaic.version = 11 : i64} {
  func.func @kernel(%arg0: i32, %arg1: memref<1x8x128xf32, #tpu.memory_space<vmem>>, %arg2: memref<1x8x128xf32, #tpu.memory_space<vmem>>, %arg3: memref<1x16x128xf32, #tpu.memory_space<vmem>>, %arg4: memref<1x8x128xf32, #tpu.memory_space<vmem>>, %arg5: memref<1x16x128xf32, #tpu.memory_space<vmem>>, %arg6: memref<128x128xf32, #tpu.memory_space<vmem>>, %arg7: memref<128x128xf32, #tpu.memory_space<vmem>>, %arg8: memref<128x128xf32, #tpu.memory_space<vmem>>, %arg9: memref<128x128xf32, #tpu.memory_space<vmem>>, %arg10: memref<1x128xf32, #tpu.memory_space<vmem>>, %arg11: memref<1x128xf32, #tpu.memory_space<vmem>>, %arg12: memref<1x128xf32, #tpu.memory_space<vmem>>, %arg13: memref<128x256xf32, #tpu.memory_space<vmem>>, %arg14: memref<1x256xf32, #tpu.memory_space<vmem>>, %arg15: memref<256x128xf32, #tpu.memory_space<vmem>>, %arg16: memref<1x128xf32, #tpu.memory_space<vmem>>, %arg17: memref<1x128xf32, #tpu.memory_space<vmem>>, %arg18: memref<1x128xf32, #tpu.memory_space<vmem>>, %arg19: memref<1x16x128xf32, #tpu.memory_space<vmem>>, %arg20: memref<1x2x16x8xf32, #tpu.memory_space<vmem>>) attributes {dimension_semantics = [#tpu.dimension_semantics<parallel>], iteration_bounds = array<i64: 2>, scalar_prefetch = 0 : i64, scratch_operands = 0 : i64, tpu.core_type = #tpu.core_type<tc>, window_params = [{transform_indices = @transform_0, window_bounds = array<i64: 1, 8, 128>}, {transform_indices = @transform_1, window_bounds = array<i64: 1, 8, 128>}, {transform_indices = @transform_2, window_bounds = array<i64: 1, 16, 128>}, {pipeline_mode = #tpu.pipeline_mode<synchronous>, transform_indices = @transform_3, window_bounds = array<i64: 1, 8, 128>}, {pipeline_mode = #tpu.pipeline_mode<synchronous>, transform_indices = @transform_4, window_bounds = array<i64: 1, 16, 128>}, {pipeline_mode = #tpu.pipeline_mode<synchronous>, transform_indices = @transform_5, window_bounds = array<i64: 128, 128>}, {pipeline_mode = #tpu.pipeline_mode<synchronous>, transform_indices = @transform_6, window_bounds = array<i64: 128, 128>}, {pipeline_mode = #tpu.pipeline_mode<synchronous>, transform_indices = @transform_7, window_bounds = array<i64: 128, 128>}, {pipeline_mode = #tpu.pipeline_mode<synchronous>, transform_indices = @transform_8, window_bounds = array<i64: 128, 128>}, {pipeline_mode = #tpu.pipeline_mode<synchronous>, transform_indices = @transform_9, window_bounds = array<i64: 1, 128>}, {pipeline_mode = #tpu.pipeline_mode<synchronous>, transform_indices = @transform_10, window_bounds = array<i64: 1, 128>}, {pipeline_mode = #tpu.pipeline_mode<synchronous>, transform_indices = @transform_11, window_bounds = array<i64: 1, 128>}, {pipeline_mode = #tpu.pipeline_mode<synchronous>, transform_indices = @transform_12, window_bounds = array<i64: 128, 256>}, {pipeline_mode = #tpu.pipeline_mode<synchronous>, transform_indices = @transform_13, window_bounds = array<i64: 1, 256>}, {pipeline_mode = #tpu.pipeline_mode<synchronous>, transform_indices = @transform_14, window_bounds = array<i64: 256, 128>}, {pipeline_mode = #tpu.pipeline_mode<synchronous>, transform_indices = @transform_15, window_bounds = array<i64: 1, 128>}, {pipeline_mode = #tpu.pipeline_mode<synchronous>, transform_indices = @transform_16, window_bounds = array<i64: 1, 128>}, {pipeline_mode = #tpu.pipeline_mode<synchronous>, transform_indices = @transform_17, window_bounds = array<i64: 1, 128>}, {transform_indices = @transform_18, window_bounds = array<i64: 1, 16, 128>}, {transform_indices = @transform_19, window_bounds = array<i64: 1, 2, 16, 8>}]} {
    %c0 = arith.constant 0 : index
    %c0_0 = arith.constant 0 : index
    %c0_1 = arith.constant 0 : index
    %0 = vector.load %arg1[%c0, %c0_0, %c0_1] : memref<1x8x128xf32, #tpu.memory_space<vmem>>, vector<1x8x128xf32>
    %1 = vector.shape_cast %0 : vector<1x8x128xf32> to vector<8x128xf32>
    %c0_2 = arith.constant 0 : index
    %c0_3 = arith.constant 0 : index
    %c0_4 = arith.constant 0 : index
    %2 = vector.load %arg4[%c0_2, %c0_3, %c0_4] : memref<1x8x128xf32, #tpu.memory_space<vmem>>, vector<1x8x128xf32>
    %3 = vector.shape_cast %2 : vector<1x8x128xf32> to vector<8x128xf32>
    %4 = arith.addf %1, %3 : vector<8x128xf32>
    %c0_5 = arith.constant 0 : index
    %c0_6 = arith.constant 0 : index
    %c0_7 = arith.constant 0 : index
    %5 = vector.load %arg2[%c0_5, %c0_6, %c0_7] : memref<1x8x128xf32, #tpu.memory_space<vmem>>, vector<1x8x128xf32>
    %6 = vector.shape_cast %5 : vector<1x8x128xf32> to vector<8x128xf32>
    %c0_8 = arith.constant 0 : index
    %c0_9 = arith.constant 0 : index
    %c0_10 = arith.constant 0 : index
    %7 = vector.load %arg4[%c0_8, %c0_9, %c0_10] : memref<1x8x128xf32, #tpu.memory_space<vmem>>, vector<1x8x128xf32>
    %8 = vector.shape_cast %7 : vector<1x8x128xf32> to vector<8x128xf32>
    %9 = arith.addf %6, %8 : vector<8x128xf32>
    %c0_11 = arith.constant 0 : index
    %c0_12 = arith.constant 0 : index
    %c0_13 = arith.constant 0 : index
    %10 = vector.load %arg3[%c0_11, %c0_12, %c0_13] : memref<1x16x128xf32, #tpu.memory_space<vmem>>, vector<1x16x128xf32>
    %11 = vector.shape_cast %10 : vector<1x16x128xf32> to vector<16x128xf32>
    %c0_14 = arith.constant 0 : index
    %c0_15 = arith.constant 0 : index
    %c0_16 = arith.constant 0 : index
    %12 = vector.load %arg5[%c0_14, %c0_15, %c0_16] : memref<1x16x128xf32, #tpu.memory_space<vmem>>, vector<1x16x128xf32>
    %13 = vector.shape_cast %12 : vector<1x16x128xf32> to vector<16x128xf32>
    %14 = arith.addf %11, %13 : vector<16x128xf32>
    %c0_17 = arith.constant 0 : index
    %c0_18 = arith.constant 0 : index
    %15 = vector.load %arg6[%c0_17, %c0_18] : memref<128x128xf32, #tpu.memory_space<vmem>>, vector<128x128xf32>
    %cst = arith.constant dense<0.000000e+00> : vector<16x128xf32>
    %16 = tpu.matmul %14, %15, %cst {dimension_numbers = #tpu.dot_dimension_numbers<[1], [0], [0], [1], [0, 0, 1, 1], [], []>} : vector<16x128xf32>, vector<128x128xf32>, vector<16x128xf32> -> vector<16x128xf32>
    %c0_19 = arith.constant 0 : index
    %c0_20 = arith.constant 0 : index
    %17 = vector.load %arg7[%c0_19, %c0_20] : memref<128x128xf32, #tpu.memory_space<vmem>>, vector<128x128xf32>
    %cst_21 = arith.constant dense<0.000000e+00> : vector<8x128xf32>
    %18 = tpu.matmul %9, %17, %cst_21 {dimension_numbers = #tpu.dot_dimension_numbers<[1], [0], [0], [1], [0, 0, 1, 1], [], []>} : vector<8x128xf32>, vector<128x128xf32>, vector<8x128xf32> -> vector<8x128xf32>
    %c0_22 = arith.constant 0 : index
    %c0_23 = arith.constant 0 : index
    %19 = vector.load %arg8[%c0_22, %c0_23] : memref<128x128xf32, #tpu.memory_space<vmem>>, vector<128x128xf32>
    %cst_24 = arith.constant dense<0.000000e+00> : vector<8x128xf32>
    %20 = tpu.matmul %4, %19, %cst_24 {dimension_numbers = #tpu.dot_dimension_numbers<[1], [0], [0], [1], [0, 0, 1, 1], [], []>} : vector<8x128xf32>, vector<128x128xf32>, vector<8x128xf32> -> vector<8x128xf32>
    %21 = vector.extract_strided_slice %16 {offsets = [0, 0], sizes = [16, 64], strides = [1, 1]} : vector<16x128xf32> to vector<16x64xf32>
    %22 = vector.extract_strided_slice %18 {offsets = [0, 0], sizes = [8, 64], strides = [1, 1]} : vector<8x128xf32> to vector<8x64xf32>
    %23 = vector.extract_strided_slice %20 {offsets = [0, 0], sizes = [8, 64], strides = [1, 1]} : vector<8x128xf32> to vector<8x64xf32>
    %cst_25 = arith.constant dense<0.000000e+00> : vector<16x8xf32>
    %24 = tpu.matmul %21, %22, %cst_25 {dimension_numbers = #tpu.dot_dimension_numbers<[1], [1], [0], [0], [0, 0, 1, 0], [], []>} : vector<16x64xf32>, vector<8x64xf32>, vector<16x8xf32> -> vector<16x8xf32>
    %cst_26 = arith.constant dense<0xFF800000> : vector<16xf32>
    %25 = vector.multi_reduction <maximumf>, %24, %cst_26 [1] : vector<16x8xf32> to vector<16xf32>
    %26 = vector.shape_cast %25 : vector<16xf32> to vector<16x1xf32>
    %27 = vector.broadcast %26 : vector<16x1xf32> to vector<16x8xf32>
    %28 = arith.subf %24, %27 : vector<16x8xf32>
    %29 = math.exp %28 : vector<16x8xf32>
    %cst_27 = arith.constant dense<0.000000e+00> : vector<16xf32>
    %30 = vector.multi_reduction <add>, %29, %cst_27 [1] : vector<16x8xf32> to vector<16xf32>
    %31 = vector.shape_cast %30 : vector<16xf32> to vector<16x1xf32>
    %32 = vector.broadcast %31 : vector<16x1xf32> to vector<16x8xf32>
    %33 = arith.divf %29, %32 : vector<16x8xf32>
    %c0_28 = arith.constant 0 : index
    %c0_29 = arith.constant 0 : index
    %c0_30 = arith.constant 0 : index
    %c0_31 = arith.constant 0 : index
    %34 = vector.load %arg20[%c0_28, %c0_29, %c0_30, %c0_31] : memref<1x2x16x8xf32, #tpu.memory_space<vmem>>, vector<1x1x16x8xf32>
    %35 = vector.shape_cast %34 : vector<1x1x16x8xf32> to vector<16x8xf32>
    %36 = vector.shape_cast %33 : vector<16x8xf32> to vector<1x1x16x8xf32>
    tpu.vector_store %arg20[%c0_28, %c0_29, %c0_30, %c0_31], %36 {strides = array<i32>} : memref<1x2x16x8xf32, #tpu.memory_space<vmem>>, vector<1x1x16x8xf32>,
    %cst_32 = arith.constant dense<0.000000e+00> : vector<16x64xf32>
    %37 = tpu.matmul %33, %23, %cst_32 {dimension_numbers = #tpu.dot_dimension_numbers<[1], [0], [0], [1], [0, 0, 1, 1], [], []>} : vector<16x8xf32>, vector<8x64xf32>, vector<16x64xf32> -> vector<16x64xf32>
    %38 = vector.extract_strided_slice %16 {offsets = [0, 64], sizes = [16, 64], strides = [1, 1]} : vector<16x128xf32> to vector<16x64xf32>
    %39 = vector.extract_strided_slice %18 {offsets = [0, 64], sizes = [8, 64], strides = [1, 1]} : vector<8x128xf32> to vector<8x64xf32>
    %40 = vector.extract_strided_slice %20 {offsets = [0, 64], sizes = [8, 64], strides = [1, 1]} : vector<8x128xf32> to vector<8x64xf32>
    %cst_33 = arith.constant dense<0.000000e+00> : vector<16x8xf32>
    %41 = tpu.matmul %38, %39, %cst_33 {dimension_numbers = #tpu.dot_dimension_numbers<[1], [1], [0], [0], [0, 0, 1, 0], [], []>} : vector<16x64xf32>, vector<8x64xf32>, vector<16x8xf32> -> vector<16x8xf32>
    %cst_34 = arith.constant dense<0xFF800000> : vector<16xf32>
    %42 = vector.multi_reduction <maximumf>, %41, %cst_34 [1] : vector<16x8xf32> to vector<16xf32>
    %43 = vector.shape_cast %42 : vector<16xf32> to vector<16x1xf32>
    %44 = vector.broadcast %43 : vector<16x1xf32> to vector<16x8xf32>
    %45 = arith.subf %41, %44 : vector<16x8xf32>
    %46 = math.exp %45 : vector<16x8xf32>
    %cst_35 = arith.constant dense<0.000000e+00> : vector<16xf32>
    %47 = vector.multi_reduction <add>, %46, %cst_35 [1] : vector<16x8xf32> to vector<16xf32>
    %48 = vector.shape_cast %47 : vector<16xf32> to vector<16x1xf32>
    %49 = vector.broadcast %48 : vector<16x1xf32> to vector<16x8xf32>
    %50 = arith.divf %46, %49 : vector<16x8xf32>
    %c0_36 = arith.constant 0 : index
    %c1 = arith.constant 1 : index
    %c0_37 = arith.constant 0 : index
    %c0_38 = arith.constant 0 : index
    %51 = vector.load %arg20[%c0_36, %c1, %c0_37, %c0_38] : memref<1x2x16x8xf32, #tpu.memory_space<vmem>>, vector<1x1x16x8xf32>
    %52 = vector.shape_cast %51 : vector<1x1x16x8xf32> to vector<16x8xf32>
    %53 = vector.shape_cast %50 : vector<16x8xf32> to vector<1x1x16x8xf32>
    tpu.vector_store %arg20[%c0_36, %c1, %c0_37, %c0_38], %53 {strides = array<i32>} : memref<1x2x16x8xf32, #tpu.memory_space<vmem>>, vector<1x1x16x8xf32>,
    %cst_39 = arith.constant dense<0.000000e+00> : vector<16x64xf32>
    %54 = tpu.matmul %50, %40, %cst_39 {dimension_numbers = #tpu.dot_dimension_numbers<[1], [0], [0], [1], [0, 0, 1, 1], [], []>} : vector<16x8xf32>, vector<8x64xf32>, vector<16x64xf32> -> vector<16x64xf32>
    %55 = tpu.concatenate %37, %54 in 1 : vector<16x64xf32>, vector<16x64xf32> -> vector<16x128xf32>
    %c0_40 = arith.constant 0 : index
    %c0_41 = arith.constant 0 : index
    %56 = vector.load %arg9[%c0_40, %c0_41] : memref<128x128xf32, #tpu.memory_space<vmem>>, vector<128x128xf32>
    %cst_42 = arith.constant dense<0.000000e+00> : vector<16x128xf32>
    %57 = tpu.matmul %55, %56, %cst_42 {dimension_numbers = #tpu.dot_dimension_numbers<[1], [0], [0], [1], [0, 0, 1, 1], [], []>} : vector<16x128xf32>, vector<128x128xf32>, vector<16x128xf32> -> vector<16x128xf32>
    %c0_43 = arith.constant 0 : index
    %c0_44 = arith.constant 0 : index
    %58 = vector.load %arg10[%c0_43, %c0_44] : memref<1x128xf32, #tpu.memory_space<vmem>>, vector<1x128xf32>
    %59 = vector.broadcast %58 : vector<1x128xf32> to vector<16x128xf32>
    %60 = arith.addf %57, %59 : vector<16x128xf32>
    %61 = arith.addf %60, %14 : vector<16x128xf32>
    %c0_45 = arith.constant 0 : index
    %c0_46 = arith.constant 0 : index
    %62 = vector.load %arg11[%c0_45, %c0_46] : memref<1x128xf32, #tpu.memory_space<vmem>>, vector<1x128xf32>
    %c0_47 = arith.constant 0 : index
    %c0_48 = arith.constant 0 : index
    %63 = vector.load %arg12[%c0_47, %c0_48] : memref<1x128xf32, #tpu.memory_space<vmem>>, vector<1x128xf32>
    %cst_49 = arith.constant dense<0.000000e+00> : vector<16xf32>
    %64 = vector.multi_reduction <add>, %61, %cst_49 [1] : vector<16x128xf32> to vector<16xf32>
    %65 = vector.shape_cast %64 : vector<16xf32> to vector<16x1xf32>
    %cst_50 = arith.constant 1.280000e+02 : f32
    %66 = vector.broadcast %cst_50 : f32 to vector<16x1xf32>
    %67 = arith.divf %65, %66 : vector<16x1xf32>
    %68 = vector.broadcast %67 : vector<16x1xf32> to vector<16x128xf32>
    %69 = arith.subf %61, %68 : vector<16x128xf32>
    %70 = arith.mulf %69, %69 : vector<16x128xf32>
    %cst_51 = arith.constant dense<0.000000e+00> : vector<16xf32>
    %71 = vector.multi_reduction <add>, %70, %cst_51 [1] : vector<16x128xf32> to vector<16xf32>
    %72 = vector.shape_cast %71 : vector<16xf32> to vector<16x1xf32>
    %cst_52 = arith.constant 1.280000e+02 : f32
    %73 = vector.broadcast %cst_52 : f32 to vector<16x1xf32>
    %74 = arith.divf %72, %73 : vector<16x1xf32>
    %75 = vector.broadcast %67 : vector<16x1xf32> to vector<16x128xf32>
    %76 = arith.subf %61, %75 : vector<16x128xf32>
    %cst_53 = arith.constant 9.99999974E-6 : f32
    %77 = vector.broadcast %cst_53 : f32 to vector<16x1xf32>
    %78 = arith.addf %74, %77 : vector<16x1xf32>
    %79 = math.rsqrt %78 : vector<16x1xf32>
    %80 = vector.broadcast %79 : vector<16x1xf32> to vector<16x128xf32>
    %81 = arith.mulf %76, %80 : vector<16x128xf32>
    %82 = vector.broadcast %62 : vector<1x128xf32> to vector<16x128xf32>
    %83 = arith.mulf %81, %82 : vector<16x128xf32>
    %84 = vector.broadcast %63 : vector<1x128xf32> to vector<16x128xf32>
    %85 = arith.addf %83, %84 : vector<16x128xf32>
    %c0_54 = arith.constant 0 : index
    %c0_55 = arith.constant 0 : index
    %86 = vector.load %arg13[%c0_54, %c0_55] : memref<128x256xf32, #tpu.memory_space<vmem>>, vector<128x256xf32>
    %cst_56 = arith.constant dense<0.000000e+00> : vector<16x256xf32>
    %87 = tpu.matmul %85, %86, %cst_56 {dimension_numbers = #tpu.dot_dimension_numbers<[1], [0], [0], [1], [0, 0, 1, 1], [], []>} : vector<16x128xf32>, vector<128x256xf32>, vector<16x256xf32> -> vector<16x256xf32>
    %c0_57 = arith.constant 0 : index
    %c0_58 = arith.constant 0 : index
    %88 = vector.load %arg14[%c0_57, %c0_58] : memref<1x256xf32, #tpu.memory_space<vmem>>, vector<1x256xf32>
    %89 = vector.broadcast %88 : vector<1x256xf32> to vector<16x256xf32>
    %90 = arith.addf %87, %89 : vector<16x256xf32>
    %cst_59 = arith.constant 0.000000e+00 : f32
    %91 = vector.broadcast %cst_59 : f32 to vector<16x256xf32>
    %92 = arith.maximumf %90, %91 : vector<16x256xf32>
    %c0_60 = arith.constant 0 : index
    %c0_61 = arith.constant 0 : index
    %93 = vector.load %arg15[%c0_60, %c0_61] : memref<256x128xf32, #tpu.memory_space<vmem>>, vector<256x128xf32>
    %cst_62 = arith.constant dense<0.000000e+00> : vector<16x128xf32>
    %94 = tpu.matmul %92, %93, %cst_62 {dimension_numbers = #tpu.dot_dimension_numbers<[1], [0], [0], [1], [0, 0, 1, 1], [], []>} : vector<16x256xf32>, vector<256x128xf32>, vector<16x128xf32> -> vector<16x128xf32>
    %c0_63 = arith.constant 0 : index
    %c0_64 = arith.constant 0 : index
    %95 = vector.load %arg16[%c0_63, %c0_64] : memref<1x128xf32, #tpu.memory_space<vmem>>, vector<1x128xf32>
    %96 = vector.broadcast %95 : vector<1x128xf32> to vector<16x128xf32>
    %97 = arith.addf %94, %96 : vector<16x128xf32>
    %98 = arith.addf %97, %85 : vector<16x128xf32>
    %c0_65 = arith.constant 0 : index
    %c0_66 = arith.constant 0 : index
    %99 = vector.load %arg17[%c0_65, %c0_66] : memref<1x128xf32, #tpu.memory_space<vmem>>, vector<1x128xf32>
    %c0_67 = arith.constant 0 : index
    %c0_68 = arith.constant 0 : index
    %100 = vector.load %arg18[%c0_67, %c0_68] : memref<1x128xf32, #tpu.memory_space<vmem>>, vector<1x128xf32>
    %cst_69 = arith.constant dense<0.000000e+00> : vector<16xf32>
    %101 = vector.multi_reduction <add>, %98, %cst_69 [1] : vector<16x128xf32> to vector<16xf32>
    %102 = vector.shape_cast %101 : vector<16xf32> to vector<16x1xf32>
    %cst_70 = arith.constant 1.280000e+02 : f32
    %103 = vector.broadcast %cst_70 : f32 to vector<16x1xf32>
    %104 = arith.divf %102, %103 : vector<16x1xf32>
    %105 = vector.broadcast %104 : vector<16x1xf32> to vector<16x128xf32>
    %106 = arith.subf %98, %105 : vector<16x128xf32>
    %107 = arith.mulf %106, %106 : vector<16x128xf32>
    %cst_71 = arith.constant dense<0.000000e+00> : vector<16xf32>
    %108 = vector.multi_reduction <add>, %107, %cst_71 [1] : vector<16x128xf32> to vector<16xf32>
    %109 = vector.shape_cast %108 : vector<16xf32> to vector<16x1xf32>
    %cst_72 = arith.constant 1.280000e+02 : f32
    %110 = vector.broadcast %cst_72 : f32 to vector<16x1xf32>
    %111 = arith.divf %109, %110 : vector<16x1xf32>
    %112 = vector.broadcast %104 : vector<16x1xf32> to vector<16x128xf32>
    %113 = arith.subf %98, %112 : vector<16x128xf32>
    %cst_73 = arith.constant 9.99999974E-6 : f32
    %114 = vector.broadcast %cst_73 : f32 to vector<16x1xf32>
    %115 = arith.addf %111, %114 : vector<16x1xf32>
    %116 = math.rsqrt %115 : vector<16x1xf32>
    %117 = vector.broadcast %116 : vector<16x1xf32> to vector<16x128xf32>
    %118 = arith.mulf %113, %117 : vector<16x128xf32>
    %119 = vector.broadcast %99 : vector<1x128xf32> to vector<16x128xf32>
    %120 = arith.mulf %118, %119 : vector<16x128xf32>
    %121 = vector.broadcast %100 : vector<1x128xf32> to vector<16x128xf32>
    %122 = arith.addf %120, %121 : vector<16x128xf32>
    %c0_74 = arith.constant 0 : index
    %c0_75 = arith.constant 0 : index
    %c0_76 = arith.constant 0 : index
    %123 = vector.load %arg19[%c0_74, %c0_75, %c0_76] : memref<1x16x128xf32, #tpu.memory_space<vmem>>, vector<1x16x128xf32>
    %124 = vector.shape_cast %123 : vector<1x16x128xf32> to vector<16x128xf32>
    %125 = vector.shape_cast %122 : vector<16x128xf32> to vector<1x16x128xf32>
    tpu.vector_store %arg19[%c0_74, %c0_75, %c0_76], %125 {strides = array<i32>} : memref<1x16x128xf32, #tpu.memory_space<vmem>>, vector<1x16x128xf32>,
    return
  }
  func.func @transform_0(%arg0: i32) -> (i32, i32, i32) {
    %c0_i32 = arith.constant 0 : i32
    %c0_i32_0 = arith.constant 0 : i32
    %c0_i32_1 = arith.constant 0 : i32
    return %arg0, %c0_i32, %c0_i32_0 : i32, i32, i32
  }
  func.func @transform_1(%arg0: i32) -> (i32, i32, i32) {
    %c0_i32 = arith.constant 0 : i32
    %c0_i32_0 = arith.constant 0 : i32
    %c0_i32_1 = arith.constant 0 : i32
    return %arg0, %c0_i32, %c0_i32_0 : i32, i32, i32
  }
  func.func @transform_2(%arg0: i32) -> (i32, i32, i32) {
    %c0_i32 = arith.constant 0 : i32
    %c0_i32_0 = arith.constant 0 : i32
    %c0_i32_1 = arith.constant 0 : i32
    return %arg0, %c0_i32, %c0_i32_0 : i32, i32, i32
  }
  func.func @transform_3(%arg0: i32) -> (i32, i32, i32) {
    %c0_i32 = arith.constant 0 : i32
    %c0_i32_0 = arith.constant 0 : i32
    %c0_i32_1 = arith.constant 0 : i32
    %c0_i32_2 = arith.constant 0 : i32
    return %c0_i32, %c0_i32_0, %c0_i32_1 : i32, i32, i32
  }
  func.func @transform_4(%arg0: i32) -> (i32, i32, i32) {
    %c0_i32 = arith.constant 0 : i32
    %c0_i32_0 = arith.constant 0 : i32
    %c0_i32_1 = arith.constant 0 : i32
    %c0_i32_2 = arith.constant 0 : i32
    return %c0_i32, %c0_i32_0, %c0_i32_1 : i32, i32, i32
  }
  func.func @transform_5(%arg0: i32) -> (i32, i32) {
    %c0_i32 = arith.constant 0 : i32
    %c0_i32_0 = arith.constant 0 : i32
    %c0_i32_1 = arith.constant 0 : i32
    return %c0_i32, %c0_i32_0 : i32, i32
  }
  func.func @transform_6(%arg0: i32) -> (i32, i32) {
    %c0_i32 = arith.constant 0 : i32
    %c0_i32_0 = arith.constant 0 : i32
    %c0_i32_1 = arith.constant 0 : i32
    return %c0_i32, %c0_i32_0 : i32, i32
  }
  func.func @transform_7(%arg0: i32) -> (i32, i32) {
    %c0_i32 = arith.constant 0 : i32
    %c0_i32_0 = arith.constant 0 : i32
    %c0_i32_1 = arith.constant 0 : i32
    return %c0_i32, %c0_i32_0 : i32, i32
  }
  func.func @transform_8(%arg0: i32) -> (i32, i32) {
    %c0_i32 = arith.constant 0 : i32
    %c0_i32_0 = arith.constant 0 : i32
    %c0_i32_1 = arith.constant 0 : i32
    return %c0_i32, %c0_i32_0 : i32, i32
  }
  func.func @transform_9(%arg0: i32) -> (i32, i32) {
    %c0_i32 = arith.constant 0 : i32
    %c0_i32_0 = arith.constant 0 : i32
    %c0_i32_1 = arith.constant 0 : i32
    return %c0_i32, %c0_i32_0 : i32, i32
  }
  func.func @transform_10(%arg0: i32) -> (i32, i32) {
    %c0_i32 = arith.constant 0 : i32
    %c0_i32_0 = arith.constant 0 : i32
    %c0_i32_1 = arith.constant 0 : i32
    return %c0_i32, %c0_i32_0 : i32, i32
  }
  func.func @transform_11(%arg0: i32) -> (i32, i32) {
    %c0_i32 = arith.constant 0 : i32
    %c0_i32_0 = arith.constant 0 : i32
    %c0_i32_1 = arith.constant 0 : i32
    return %c0_i32, %c0_i32_0 : i32, i32
  }
  func.func @transform_12(%arg0: i32) -> (i32, i32) {
    %c0_i32 = arith.constant 0 : i32
    %c0_i32_0 = arith.constant 0 : i32
    %c0_i32_1 = arith.constant 0 : i32
    return %c0_i32, %c0_i32_0 : i32, i32
  }
  func.func @transform_13(%arg0: i32) -> (i32, i32) {
    %c0_i32 = arith.constant 0 : i32
    %c0_i32_0 = arith.constant 0 : i32
    %c0_i32_1 = arith.constant 0 : i32
    return %c0_i32, %c0_i32_0 : i32, i32
  }
  func.func @transform_14(%arg0: i32) -> (i32, i32) {
    %c0_i32 = arith.constant 0 : i32
    %c0_i32_0 = arith.constant 0 : i32
    %c0_i32_1 = arith.constant 0 : i32
    return %c0_i32, %c0_i32_0 : i32, i32
  }
  func.func @transform_15(%arg0: i32) -> (i32, i32) {
    %c0_i32 = arith.constant 0 : i32
    %c0_i32_0 = arith.constant 0 : i32
    %c0_i32_1 = arith.constant 0 : i32
    return %c0_i32, %c0_i32_0 : i32, i32
  }
  func.func @transform_16(%arg0: i32) -> (i32, i32) {
    %c0_i32 = arith.constant 0 : i32
    %c0_i32_0 = arith.constant 0 : i32
    %c0_i32_1 = arith.constant 0 : i32
    return %c0_i32, %c0_i32_0 : i32, i32
  }
  func.func @transform_17(%arg0: i32) -> (i32, i32) {
    %c0_i32 = arith.constant 0 : i32
    %c0_i32_0 = arith.constant 0 : i32
    %c0_i32_1 = arith.constant 0 : i32
    return %c0_i32, %c0_i32_0 : i32, i32
  }
  func.func @transform_18(%arg0: i32) -> (i32, i32, i32) {
    %c0_i32 = arith.constant 0 : i32
    %c0_i32_0 = arith.constant 0 : i32
    %c0_i32_1 = arith.constant 0 : i32
    return %arg0, %c0_i32, %c0_i32_0 : i32, i32, i32
  }
  func.func @transform_19(%arg0: i32) -> (i32, i32, i32, i32) {
    %c0_i32 = arith.constant 0 : i32
    %c0_i32_0 = arith.constant 0 : i32
    %c0_i32_1 = arith.constant 0 : i32
    %c0_i32_2 = arith.constant 0 : i32
    return %arg0, %c0_i32, %c0_i32_0, %c0_i32_1 : i32, i32, i32, i32
  }
}

</mosaic_0001>

<bundles_post_ra>
// kernel: tpu_custom_call.1
= control target key start
LH: loop header
LB: loop body
LE: loop exit
PB: predicated region body
PF: predicated region fallthrough
CT: control target
= control target key end

     0   :  { %s3643_s0 = inlined_call_operand.hbm [shape: f32[2,8,128], index: 0, kind: input, shape index: {}]   ;;  %s3644_s1 = inlined_call_operand.hbm [shape: f32[2,8,128], index: 1, kind: input, shape index: {}]   ;;  %s3645_s2 = inlined_call_operand.hbm [shape: f32[2,16,128], index: 2, kind: input, shape index: {}]   ;;  %s3646_s3 = inlined_call_operand.hbm [shape: f32[1,8,128], index: 3, kind: input, shape index: {}]   ;;  %s3647_s4 = inlined_call_operand.hbm [shape: f32[1,16,128], index: 4, kind: input, shape index: {}]   ;;  %s3648_s5 = inlined_call_operand.hbm [shape: f32[128,128], index: 5, kind: input, shape index: {}]   ;;  %s3649_s6 = inlined_call_operand.hbm [shape: f32[128,128], index: 6, kind: input, shape index: {}]   ;;  %s3650_s7 = inlined_call_operand.hbm [shape: f32[128,128], index: 7, kind: input, shape index: {}]   ;;  %s3651_s8 = inlined_call_operand.hbm [shape: f32[128,128], index: 8, kind: input, shape index: {}]   ;;  %s3652_s9 = inlined_call_operand.vmem [shape: f32[1,128], index: 9, kind: input, shape index: {}]   ;;  %s3653_s10 = inlined_call_operand.vmem [shape: f32[1,128], index: 10, kind: input, shape index: {}]   ;;  %s3654_s11 = inlined_call_operand.vmem [shape: f32[1,128], index: 11, kind: input, shape index: {}]   ;;  %s3655_s12 = inlined_call_operand.hbm [shape: f32[128,256], index: 12, kind: input, shape index: {}]   ;;  %s3656_s13 = inlined_call_operand.vmem [shape: f32[1,256], index: 13, kind: input, shape index: {}]   ;;  %s3657_s14 = inlined_call_operand.hbm [shape: f32[256,128], index: 14, kind: input, shape index: {}]   ;;  %s3658_s15 = inlined_call_operand.vmem [shape: f32[1,128], index: 15, kind: input, shape index: {}]   ;;  %s3659_s16 = inlined_call_operand.vmem [shape: f32[1,128], index: 16, kind: input, shape index: {}]   ;;  %s3660_s17 = inlined_call_operand.vmem [shape: f32[1,128], index: 17, kind: input, shape index: {}]   ;;  %s3661_s18 = inlined_call_operand.hbm [shape: f32[2,16,128], index: 18, kind: output, shape index: {0}]   ;;  %s3662_s19 = inlined_call_operand.vmem [shape: f32[2,2,16,8], index: 19, kind: output, shape index: {1}]  }
   0x1   :  { %3688 = sst [smem:[#allocation34_spill]] %s3643_s0 }
   0x2   :  { %3689 = sst [smem:[#allocation35_spill]] %s3644_s1 }
   0x3   :  { %3690 = sst [smem:[#allocation36_spill]] %s3645_s2 }
   0x4   :  { %3691 = sst [smem:[#allocation37_spill]] %s3646_s3 }
   0x5   :  { %3692 = sst [smem:[#allocation38_spill]] %s3647_s4 }
   0x6   :  { %3693 = sst [smem:[#allocation39_spill]] %s3648_s5 }
   0x7   :  { %3694 = sst [smem:[#allocation40_spill]] %s3649_s6 }
   0x8   :  { %3695 = sst [smem:[#allocation41_spill]] %s3650_s7 }
   0x9   :  { %3696 = sst [smem:[#allocation42_spill]] %s3651_s8 }
   0xa   :  { %3697 = sst [smem:[#allocation43_spill]] %s3654_s11 }
   0xb   :  { %3698 = sst [smem:[#allocation44_spill]] %s3655_s12 }
   0xc   :  { %3699 = sst [smem:[#allocation45_spill]] %s3656_s13 }
   0xd   :  { %3700 = sst [smem:[#allocation46_spill]] %s3658_s15 }
   0xe   :  { %3701 = sst [smem:[#allocation47_spill]] %s3659_s16 }
   0xf   :  { %3702 = sst [smem:[#allocation48_spill]] %s3660_s17 }
  0x10   :  { %3703 = sst [smem:[#allocation49_spill]] %s3661_s18 }
  0x11   :  { %25 = vsyncpa [#allocation3], 0 }
  0x12   :  { %27 = vsyncpa [#allocation3 + $0x1], 0 }
  0x13   :  { %28 = vsyncpa [#allocation6], 0 }
  0x14   :  { %30 = vsyncpa [#allocation6 + $0x1], 0 }
  0x15   :  { %31 = vsyncpa [#allocation9], 0 }
  0x16   :  { %32 = vsyncpa [#allocation12], 0 }
  0x17   :  { %33 = vsyncpa [#allocation15], 0 }
  0x18   :  { %34 = vsyncpa [#allocation18], 0 }
  0x19   :  { %35 = vsyncpa [#allocation4], 0 }
  0x1a   :  { %37 = vsyncpa [#allocation4 + $0x1], 0  ;;  %s3167_s0 = smov 0   ;;  %s3169_s30 = smov 0  }
  0x1b   :  { %s3171_s20 = smov 0   ;;  %s3173_s21 = smov 0  }
  0x1c LB: > { %3704 = sst [smem:[#allocation28_spill]] %s3032_s0  ;;  %s3046_s1 = smov [#allocation8]   ;;  %s3044_s21 = sphi %s3173_s21, %s3759_s21   ;;  %s3040_s20 = sphi %s3171_s20, %s3761_s20   ;;  %s3036_s30 = sphi %s3169_s30, %s3763_s30   ;;  %s3032_s0 = sphi %s3167_s0, %s3762_s0  }
  0x1d   : > { %3705 = sst [smem:[#allocation29_spill]] %s3040_s20  ;;  %s506_s22 = sshll.u32 %s3046_s1, 4  ;;  %s507_s22 = int_to_ptr.vmem [resolvable:$true] %s506_s22 }
  0x1e   : > { %s3188_s2 = sadd.s32 4294967295, %s3044_s21   ;;  %p2155_p0 = scmp.ge.s32.totalorder %s3044_s21, 1 }
  0x1f   : > { %p3679_p1 = scmp.eq.s32.totalorder %s3188_s2, 0  ;;  %p493_p2 = scmp.lt.s32.totalorder %s3044_s21, 3 }
  0x20   : > { %s3047_s24 = smov [#allocation11]   ;;  %s3048_s26 = smov [#allocation14]  }
  0x21   : > { %p3193_p3 = pnand %p2155_p0, %p493_p2  ;;  %s529_s25 = sshll.u32 %s3047_s24, 4  ;;  %s3206_s25 = int_to_ptr.vmem [resolvable:$true] %s529_s25 }
  0x22   : > { %s555_s27 = sshll.u32 %s3048_s26, 4  ;;  %s2679_s29 = scalar_lea.vmem %s507_s22, 128  ;;  %s3208_s27 = int_to_ptr.vmem [resolvable:$true] %s555_s27 }
  0x23   : > { %s3706_s23 = scalar_select %p3193_p3, 1, 0 }
  0x24   : > { %p2533_p5 = pneg %p3193_p3  ;;  %p2680_p8 = scmp.ne.s32.totalorder %s507_s22, %s2679_s29 }
  0x25   : > { %p2687_p11 = scmp.lt.s32.totalorder %s507_s22, %s507_s22  ;;  %p2688_p12 = scmp.lt.s32.totalorder %s2679_s29, %s2679_s29 }
  0x26   : > { %p3202_p6 = pnand %p2533_p5, %p3679_p1 }
  0x27   : > { %p2689_p13 = por %p2688_p12, %p2687_p11 }
  0x28   : > { %s3707_s3 = scalar_select %p3202_p6, 1, 0 }
  0x29   : > { %p3212_p7 = pneg %p3202_p6 }
  0x2b   : > { %s3708_s28 = scalar_select %p3212_p7, 1, 0 }
  0x2c   : > { %p2682_p9 = pnand %p2680_p8, %p3212_p7 }
  0x2e   : > { %p2683_p10 = pneg %p2682_p9 }
  0x30   : > { %p2690_p0 = pnand %p2689_p13, %p2683_p10 }
  0x32   : > { %2693 = shalt.err (!%p2690_p0)
}
  0x33   : > { %s3709_s26 = sld [smem:[#allocation37_spill]]  ;;  %s2705_s18 = scalar_lea.vmem %s3206_s25, 2048 }
  0x34   : > { %p2706_p2 = scmp.ne.s32.totalorder %s3206_s25, %s2705_s18  ;;  %p2713_p9 = scmp.lt.s32.totalorder %s3206_s25, %s3206_s25 }
  0x35   : > { %p2714_p11 = scmp.lt.s32.totalorder %s2705_s18, %s2705_s18 }
  0x36   : > { %p2708_p5 = pnand %p2706_p2, %p3212_p7 }
  0x37   : > { %p2715_p10 = por %p2714_p11, %p2713_p9 }
  0x38   : > { %p2709_p8 = pneg %p2708_p5 }
  0x39   : > { %2536 = dma.hbm_to_vmem [thread:$0]  (!%p3202_p6), %s3709_s26, 128, %s507_s22, [#allocation9]  }
  0x3a   : > { %p2716_p12 = pnand %p2715_p10, %p2709_p8 }
  0x3c   : > { %2719 = shalt.err (!%p2716_p12)
}
  0x3d   : > { %s3667_s29 = smov 128   ;;  %s3669_s1 = smov 8  }
  0x3e   : > { %s3710_s5 = sld [smem:[#allocation39_spill]]  ;;  %s2731_s18 = scalar_lea.vmem %s3208_s27, 2048 }
  0x3f   : > { %p2732_p13 = scmp.ne.s32.totalorder %s3208_s27, %s2731_s18  ;;  %p2739_p5 = scmp.lt.s32.totalorder %s3208_s27, %s3208_s27 }
  0x40   : > { %p2740_p8 = scmp.lt.s32.totalorder %s2731_s18, %s2731_s18 }
  0x41   : > { %p2734_p0 = pnand %p2732_p13, %p3212_p7 }
  0x42   : > { %p2741_p9 = por %p2740_p8, %p2739_p5 }
  0x43   : > { %p2735_p2 = pneg %p2734_p0 }
  0x44   : > { %2542 = dma.hbm_to_vmem [thread:$0]  (!%p3202_p6), %s3710_s5, 2048, %s3206_s25, [#allocation12], %s3667_s29, %s3667_s29, %s3669_s1  }
  0x45   : > { %p2742_p11 = pnand %p2741_p9, %p2735_p2 }
  0x47   : > { %2745 = shalt.err (!%p2742_p11)
}
  0x48   : > { %s3711_s7 = sld [smem:[#allocation41_spill]]  ;;  %s3051_s25 = smov [#allocation17]  }
  0x49   : > { %s590_s24 = sshll.u32 %s3051_s25, 4  ;;  %s591_s24 = int_to_ptr.vmem [resolvable:$true] %s590_s24 }
  0x4a   : > { %s2757_s5 = scalar_lea.vmem %s591_s24, 4096  ;;  %p2765_p0 = scmp.lt.s32.totalorder %s591_s24, %s591_s24 }
  0x4b   : > { %p2758_p10 = scmp.ne.s32.totalorder %s591_s24, %s2757_s5  ;;  %p2766_p2 = scmp.lt.s32.totalorder %s2757_s5, %s2757_s5 }
  0x4d   : > { %p2760_p12 = pnand %p2758_p10, %p3212_p7  ;;  %p2767_p5 = por %p2766_p2, %p2765_p0 }
  0x4e   : > { %2548 = dma.hbm_to_vmem [thread:$0]  (!%p3202_p6), %s3711_s7, 2048, %s3208_s27, [#allocation15], %s3667_s29, %s3667_s29, %s3669_s1  }
  0x4f   : > { %p2761_p13 = pneg %p2760_p12 }
  0x51   : > { %p2768_p8 = pnand %p2767_p5, %p2761_p13 }
  0x53   : > { %2771 = shalt.err (!%p2768_p8)
}
  0x54   : > { %s3052_s18 = smov 256   ;;  %s3053_s27 = smov 16  }
  0x55   : > { %s3712_s12 = sld [smem:[#allocation44_spill]]  ;;  %s2154_s22 = sadd.s32 4294967294, %s3044_s21  }
  0x56   : > { %s3262_s25 = sadd.s32 1, %s3044_s21   ;;  %s50_s1 = sadd.s32 1, %s3040_s20 }
  0x57   : > { %3713 = sst [smem:[#allocation30_spill]] %s3262_s25  ;;  %s47_s29 = ssub.s32 %s3044_s21, %s3262_s25 }
  0x58   : > { %p48_p9 = scmp.eq.s32.totalorder %s47_s29, 0  ;;  %p57_p11 = scmp.ne.s32.totalorder %s3040_s20, %s3036_s30 }
  0x59   : > { %p58_p10 = scmp.eq.s32.totalorder %s3044_s21, 0  ;;  %p63_p12 = scmp.ne.s32.totalorder %s3036_s30, %s3032_s0 }
  0x5a   : > { %s3273_s7 = scalar_select %p48_p9, %s3040_s20, %s50_s1  }
  0x5b   : > { %2554 = dma.hbm_to_vmem [thread:$0]  (!%p3202_p6), %s3712_s12, 4096, %s591_s24, [#allocation18], %s3052_s18, %s3052_s18, %s3053_s27  }
  0x5c   : > { %3714 = sst [smem:[#allocation31_spill]] %s3273_s7  ;;  %p59_p13 = por %p58_p10, %p57_p11 }
  0x5d   : > { %p3277_p0 = por %p3679_p1, %p63_p12  ;;  %p454_p2 = scmp.eq.s32.totalorder %s3188_s2, 1 }
  0x5e   : > { %p460_p5 = scmp.eq.s32.totalorder %s2154_s22, 1  ;;  %p2580_p8 = scmp.lt.s32.totalorder %s3044_s21, 2 }
  0x5f   : > { %s3715_s5 = scalar_select %p3277_p0, 1, 0 }
  0x60   : > { %s3284_s24 = sand.u32 1, %s3040_s20   ;;  %p3286_p4 = por %p454_p2, %p57_p11 }
  0x61   : > { %p3290_p9 = por %p460_p5, %p63_p12  ;;  %s3678_s18 = sshll.u32 %s3284_s24, 3 }
  0x62   : > { %s3716_s29 = scalar_select %p3286_p4, 1, 0 }
  0x63   : > { %s3718_s1 = scalar_select %p3290_p9, 1, 0 }
  0x64   : > { %3717 = sst [smem:[#allocation32_spill]] %s3716_s29  ;;  %s3683_s27 = sshll.u32 %s3044_s21, 7 }
  0x65   : > { %3719 = sst [smem:[#allocation33_spill]] %s3718_s1  ;;  %p3296_p10 = pnand %p2580_p8, %p59_p13 }
  0x66   : > { %s647_s22 = sand.u32 1, %s3044_s21   ;;  %s3721_s20 = sld [smem:[#allocation35_spill]] }
  0x67   : > { %s651_s29 = scalar_lea.vmem [#allocation5], %s3678_s18  ;;  %s3311_s16 = scalar_lea.sflag [#allocation6], %s647_s22 }
  0x68   : > { %s658_s1 = sshll.u32 %s651_s29, 4  ;;  %p3317_p12 = pneg %p3296_p10  ;;  %s659_s1 = int_to_ptr.vmem [resolvable:$true] %s658_s1 }
  0x6c   : > { %s3722_s25 = smov %s3721_s20  ;;  %s3306_s0 = scalar_lea.hbm %s3721_s20, %s3683_s27 }
  0x6d   : > { %s2772_s15 = scalar_lea.hbm %s3306_s0, 128  ;;  %s2777_s20 = scalar_lea.hbm %s3722_s25, 256 }
  0x6e   : > { %p2773_p11 = scmp.ne.s32.totalorder %s3306_s0, %s2772_s15  ;;  %p2778_p5 = scmp.lt.s32.totalorder %s3306_s0, %s3722_s25 }
  0x6f   : > { %p2779_p8 = scmp.lt.s32.totalorder %s2777_s20, %s2772_s15 }
  0x70   : > { %p2775_p13 = pnand %p3317_p12, %p2773_p11 }
  0x71   : > { %p2780_p1 = por %p2779_p8, %p2778_p5 }
  0x72   : > { %p2776_p2 = pneg %p2775_p13 }
  0x74   : > { %p2781_p9 = pnand %p2780_p1, %p2776_p2 }
  0x76   : > { %2784 = shalt.err (!%p2781_p9)
}
  0x77   : > { %s2785_s22 = scalar_lea.vmem %s659_s1, 128  ;;  %s3054_s27 = smov [#allocation5]  }
  0x78   : > { %p2786_p4 = scmp.ne.s32.totalorder %s659_s1, %s2785_s22  ;;  %s2790_s17 = sshll.u32 %s3054_s27, 4  ;;  %s2791_s17 = int_to_ptr.vmem [resolvable:$false] %s2790_s17 }
  0x79   : > { %s2792_s11 = scalar_lea.vmem %s2791_s17, 256  ;;  %p2793_p11 = scmp.lt.s32.totalorder %s659_s1, %s2791_s17 }
  0x7a   : > { %p2788_p0 = pnand %p2786_p4, %p3317_p12  ;;  %p2794_p13 = scmp.lt.s32.totalorder %s2792_s11, %s2785_s22 }
  0x7c   : > { %p2789_p3 = pneg %p2788_p0  ;;  %p2795_p6 = por %p2794_p13, %p2793_p11 }
  0x7e   : > { %p2796_p7 = pnand %p2795_p6, %p2789_p3 }
  0x80   : > { %2799 = shalt.err (!%p2796_p7)
}
  0x81   : > { %2564 = dma.hbm_to_vmem [thread:$0]  (!%p3296_p10), %s3306_s0, 128, %s659_s1, %s3311_s16  }
  0x82   : > { %s3724_s15 = sshll.u32 %s3284_s24, 4  ;;  %s3055_s27 = smov [#allocation10]  }
  0x83   : > { %s669_s18 = scalar_lea.vmem [#allocation7], %s3724_s15  ;;  %s516_s12 = sshll.u32 %s3055_s27, 4  ;;  %s517_s12 = int_to_ptr.vmem [resolvable:$true] %s516_s12 }
  0x84   : > { %s676_s7 = sshll.u32 %s669_s18, 4  ;;  %s2811_s17 = scalar_lea.vmem %s517_s12, 256  ;;  %s3338_s7 = int_to_ptr.vmem [resolvable:$true] %s676_s7 }
  0x85   : > { %p2812_p1 = scmp.ne.s32.totalorder %s517_s12, %s2811_s17  ;;  %p3725_p4 = scmp.ne.s32.totalorder %s3708_s28, 0 }
  0x86   : > { %p2819_p7 = scmp.lt.s32.totalorder %s517_s12, %s517_s12  ;;  %p2820_p0 = scmp.lt.s32.totalorder %s2811_s17, %s2811_s17 }
  0x87   : > { %p2814_p3 = pnand %p2812_p1, %p3725_p4 }
  0x88   : > { %p2821_p9 = por %p2820_p0, %p2819_p7 }
  0x89   : > { %p2815_p6 = pneg %p2814_p3 }
  0x8b   : > { %p2822_p2 = pnand %p2821_p9, %p2815_p6 }
  0x8d   : > { %2825 = shalt.err (!%p2822_p2)
}
  0x8e   : > { %p3726_p5 = scmp.ne.s32.totalorder %s3707_s3, 0  ;;  %s3727_s11 = smov 8  }
  0x8f   : > { %s3728_s0 = smov 128   ;;  %s3729_s4 = sld [smem:[#allocation38_spill]] }
  0x90   : > { %s3056_s29 = smov [#allocation13]   ;;  %s3057_s15 = smov [#allocation16]  }
  0x91   : > { %s542_s22 = sshll.u32 %s3056_s29, 4  ;;  %s568_s18 = sshll.u32 %s3057_s15, 4  ;;  %s543_s22 = int_to_ptr.vmem [resolvable:$true] %s542_s22  ;;  %s569_s18 = int_to_ptr.vmem [resolvable:$true] %s568_s18 }
  0x92   : > { %s2837_s27 = scalar_lea.vmem %s543_s22, 2048  ;;  %p2845_p1 = scmp.lt.s32.totalorder %s543_s22, %s543_s22 }
  0x93   : > { %p2838_p8 = scmp.ne.s32.totalorder %s543_s22, %s2837_s27  ;;  %p2846_p3 = scmp.lt.s32.totalorder %s2837_s27, %s2837_s27 }
  0x95   : > { %2539 = dma.hbm_to_vmem [thread:$0]  (!%p3726_p5), %s3729_s4, 256, %s517_s12, [#allocation9], %s3728_s0, %s3728_s0, %s3727_s11  }
  0x96   : > { %p2840_p11 = pnand %p2838_p8, %p3725_p4  ;;  %p2847_p6 = por %p2846_p3, %p2845_p1 }
  0x98   : > { %p2841_p13 = pneg %p2840_p11 }
  0x9a   : > { %p2848_p7 = pnand %p2847_p6, %p2841_p13 }
  0x9c   : > { %2851 = shalt.err (!%p2848_p7)
}
  0x9d   : > { %s3730_s6 = sld [smem:[#allocation40_spill]]  ;;  %s2863_s1 = scalar_lea.vmem %s569_s18, 2048 }
  0x9e   : > { %p2864_p0 = scmp.ne.s32.totalorder %s569_s18, %s2863_s1  ;;  %p2871_p8 = scmp.lt.s32.totalorder %s569_s18, %s569_s18 }
  0x9f   : > { %p2872_p11 = scmp.lt.s32.totalorder %s2863_s1, %s2863_s1 }
  0xa0   : > { %p2866_p9 = pnand %p2864_p0, %p3725_p4 }
  0xa1   : > { %p2873_p13 = por %p2872_p11, %p2871_p8 }
  0xa2   : > { %p2867_p2 = pneg %p2866_p9 }
  0xa3   : > { %2545 = dma.hbm_to_vmem [thread:$0]  (!%p3726_p5), %s3730_s6, 2048, %s543_s22, [#allocation12], %s3728_s0, %s3728_s0, %s3727_s11  }
  0xa4   : > { %p2874_p1 = pnand %p2873_p13, %p2867_p2 }
  0xa6   : > { %2877 = shalt.err (!%p2874_p1)
}
  0xa7   : > { %s3731_s8 = sld [smem:[#allocation42_spill]]  ;;  %s3058_s22 = smov [#allocation19]  }
  0xa8   : > { %s606_s15 = sshll.u32 %s3058_s22, 4  ;;  %s607_s15 = int_to_ptr.vmem [resolvable:$true] %s606_s15 }
  0xa9   : > { %s2889_s27 = scalar_lea.vmem %s607_s15, 4096  ;;  %p2897_p0 = scmp.lt.s32.totalorder %s607_s15, %s607_s15 }
  0xaa   : > { %p2890_p3 = scmp.ne.s32.totalorder %s607_s15, %s2889_s27  ;;  %p2898_p9 = scmp.lt.s32.totalorder %s2889_s27, %s2889_s27 }
  0xac   : > { %p2892_p6 = pnand %p2890_p3, %p3725_p4  ;;  %p2899_p2 = por %p2898_p9, %p2897_p0 }
  0xad   : > { %2551 = dma.hbm_to_vmem [thread:$0]  (!%p3726_p5), %s3731_s8, 2048, %s569_s18, [#allocation15], %s3728_s0, %s3728_s0, %s3727_s11  }
  0xae   : > { %p2893_p7 = pneg %p2892_p6 }
  0xb0   : > { %p2900_p8 = pnand %p2899_p2, %p2893_p7 }
  0xb2   : > { %2903 = shalt.err (!%p2900_p8)
}
  0xb3   : > { %2557 = dma.hbm_to_vmem [thread:$0]  (!%p3726_p5), %s3657_s14, 4096, %s607_s15, [#allocation18], %s3728_s0, %s3728_s0, %s3727_s11  }
  0xb4   : > { %s3732_s28 = sshll.u32 %s3044_s21, 7  ;;  %s3733_s20 = sld [smem:[#allocation34_spill]] }
  0xb5   : > { %s3735_s27 = sshll.u32 %s3284_s24, 3  ;;  %s2210_s12 = sshll.u32 %s3044_s21, 8 }
  0xb6   : > { %s633_s3 = scalar_lea.vmem [#allocation2], %s3735_s27  ;;  %s630_s18 = scalar_lea.sflag [#allocation3], %s3284_s24 }
  0xb7   : > { %s640_s4 = sshll.u32 %s633_s3, 4  ;;  %s641_s4 = int_to_ptr.vmem [resolvable:$true] %s640_s4 }
  0xba   : > { %s3734_s29 = smov %s3733_s20  ;;  %s3385_s22 = scalar_lea.hbm %s3733_s20, %s3732_s28 }
  0xbb   : > { %s2904_s6 = scalar_lea.hbm %s3385_s22, 128  ;;  %s2909_s17 = scalar_lea.hbm %s3734_s29, 256 }
  0xbc   : > { %p2905_p4 = scmp.ne.s32.totalorder %s3385_s22, %s2904_s6  ;;  %p2910_p13 = scmp.lt.s32.totalorder %s3385_s22, %s3734_s29 }
  0xbd   : > { %p2911_p1 = scmp.lt.s32.totalorder %s2909_s17, %s2904_s6 }
  0xbe   : > { %p2907_p11 = pnand %p2905_p4, %p3317_p12 }
  0xbf   : > { %p2912_p3 = por %p2911_p1, %p2910_p13 }
  0xc0   : > { %p2908_p5 = pneg %p2907_p11 }
  0xc2   : > { %p2913_p6 = pnand %p2912_p3, %p2908_p5 }
  0xc4   : > { %2916 = shalt.err (!%p2913_p6)
}
  0xc5   : > { %s2917_s20 = scalar_lea.vmem %s641_s4, 128  ;;  %s3059_s24 = smov [#allocation2]  }
  0xc6   : > { %p2918_p7 = scmp.ne.s32.totalorder %s641_s4, %s2917_s20  ;;  %s2922_s27 = sshll.u32 %s3059_s24, 4  ;;  %s2923_s27 = int_to_ptr.vmem [resolvable:$false] %s2922_s27 }
  0xc7   : > { %s2924_s3 = scalar_lea.vmem %s2923_s27, 256  ;;  %p2925_p2 = scmp.lt.s32.totalorder %s641_s4, %s2923_s27 }
  0xc8   : > { %p2920_p0 = pnand %p2918_p7, %p3317_p12  ;;  %p2926_p8 = scmp.lt.s32.totalorder %s2924_s3, %s2917_s20 }
  0xca   : > { %p2921_p9 = pneg %p2920_p0  ;;  %p2927_p4 = por %p2926_p8, %p2925_p2 }
  0xcc   : > { %p2928_p11 = pnand %p2927_p4, %p2921_p9 }
  0xce   : > { %2931 = shalt.err (!%p2928_p11)
}
  0xcf   : > { %2561 = dma.hbm_to_vmem [thread:$0]  (!%p3296_p10), %s3385_s22, 128, %s641_s4, %s630_s18  }
  0xd0   : > { %s3736_s15 = sld [smem:[#allocation36_spill]] }
  0xd6   : > { %s675_s17 = scalar_lea.hbm %s3736_s15, %s2210_s12  ;;  %s2937_s20 = scalar_lea.hbm %s3736_s15, 512 }
  0xd7   : > { %s2932_s28 = scalar_lea.hbm %s675_s17, 256  ;;  %p2938_p3 = scmp.lt.s32.totalorder %s675_s17, %s3736_s15 }
  0xd8   : > { %p2933_p5 = scmp.ne.s32.totalorder %s675_s17, %s2932_s28  ;;  %p2939_p6 = scmp.lt.s32.totalorder %s2937_s20, %s2932_s28 }
  0xda   : > { %p2935_p13 = pnand %p2933_p5, %p3317_p12  ;;  %p2940_p7 = por %p2939_p6, %p2938_p3 }
  0xdc   : > { %p2936_p1 = pneg %p2935_p13 }
  0xde   : > { %p2941_p0 = pnand %p2940_p7, %p2936_p1 }
  0xe0   : > { %2944 = shalt.err (!%p2941_p0)
}
  0xe1   : > { %s2945_s4 = scalar_lea.vmem %s3338_s7, 256  ;;  %s3060_s22 = smov [#allocation7]  }
  0xe2   : > { %p2946_p9 = scmp.ne.s32.totalorder %s3338_s7, %s2945_s4  ;;  %s2950_s12 = sshll.u32 %s3060_s22, 4  ;;  %s2951_s12 = int_to_ptr.vmem [resolvable:$false] %s2950_s12 }
  0xe3   : > { %s2952_s18 = scalar_lea.vmem %s2951_s12, 512  ;;  %p2953_p4 = scmp.lt.s32.totalorder %s3338_s7, %s2951_s12 }
  0xe4   : > { %p2948_p2 = pnand %p2946_p9, %p3317_p12  ;;  %p2954_p11 = scmp.lt.s32.totalorder %s2952_s18, %s2945_s4 }
  0xe6   : > { %p2949_p8 = pneg %p2948_p2  ;;  %p2955_p5 = por %p2954_p11, %p2953_p4 }
  0xe8   : > { %p2956_p13 = pnand %p2955_p5, %p2949_p8 }
  0xea   : > { %2959 = shalt.err (!%p2956_p13)
}
  0xeb   : > { %2567 = dma.hbm_to_vmem [thread:$0]  (!%p3296_p10), %s675_s17, 256, %s3338_s7, %s3311_s16, %s3728_s0, %s3728_s0, %s3727_s11  }
  0xec   : > { %p3737_p12 = scmp.ne.s32.totalorder %s3706_s23, 0 }
  0xed   : > { %s3433_s13 = sand.u32 (!%p3737_p12), 1, %s3036_s30   ;;  %p3738_p1 = scmp.ne.s32.totalorder (!%p3737_p12), %s3715_s5, 0 }
  0xee   : > { %688 = sbr.rel (%p3737_p12) target bundleno = 2661 (0xa65), region = 92  ;;  %s2173_s6 = sshll.u32 (!%p3737_p12), %s3433_s13, 3 }
  0xef   : > { %s691_s8 = scalar_lea.sflag (!%p3737_p12), [#allocation3], %s3433_s13  ;;  %s3437_s28 = scalar_lea.vmem (!%p3737_p12), [#allocation2], %s2173_s6 }
  0xf3   : > { %3003 = dma.done.wait (%p3738_p1), %s691_s8, 128  }
  0xf4   : > { %3005 = vsyncadd (%p3738_p1), %s691_s8, 4294967168  ;;  %s699_s16 = sand.u32 1, %s3188_s2   ;;  %s3444_s26 = scalar_lea.vmem [#allocation5], %s2173_s6 }
  0xf5   : > { %s700_s23 = scalar_lea.sflag [#allocation6], %s699_s16 }
  0xf6   : > { %3007 = dma.done.wait (%p3738_p1), %s700_s23, 384  }
  0xf7   : > { %3009 = vsyncadd (%p3738_p1), %s700_s23, 4294966912  ;;  %s2175_s7 = sshll.u32 %s3433_s13, 4  ;;  %p3739_p10 = scmp.eq.s32.totalorder %s3188_s2, 0 }
  0xf8   : > { %s3453_s11 = scalar_lea.vmem [#allocation7], %s2175_s7 }
  0xf9   : > { %3011 = dma.done.wait (%p3739_p10), [#allocation9], 384   ;;  %p3740_p3 = pmov %p3739_p10 }
  0xfb   : > { %3013 = vsyncadd (%p3740_p3), [#allocation9], 4294966912  ;;  %p3741_p6 = pmov %p3740_p3 }
  0xfc   : > { %p3742_p7 = pmov %p3740_p3 }
  0xfd   : > { %3015 = dma.done.wait (%p3741_p6), [#allocation12], 4096  }
  0xfe   : > { %3017 = vsyncadd (%p3742_p7), [#allocation12], 4294963200  ;;  %p3743_p0 = pmov %p3740_p3 }
 0x100   : > { %3019 = dma.done.wait (%p3743_p0), [#allocation15], 4096   ;;  %p3744_p9 = pmov %p3743_p0 }
 0x101   : > { %p3745_p2 = pmov %p3743_p0 }
 0x102   : > { %3021 = vsyncadd (%p3744_p9), [#allocation15], 4294963200 }
 0x103   : > { %3023 = dma.done.wait (%p3745_p2), [#allocation18], 8192   ;;  %p3746_p8 = pmov %p3743_p0 }
 0x104   : > { %v3061_v0 = vmov 0.0   ;;  %vm3062_vm0 = vmmov 0   ;;  %v845_v1 = vld [vmem:[#allocation11 + $0x78] sm:$0xff]  ;;  %v844_v3 = vld [vmem:[#allocation11 + $0x70] sm:$0xff]  ;;  %v843_v5 = vld [vmem:[#allocation11 + $0x68] sm:$0xff]  ;;  %vm1093_vm1 = vcmask 523264  }
 0x105   : > { %3025 = vsyncadd (%p3746_p8), [#allocation18], 4294959104  ;;  %2368 = vmatprep.subr.mxu1 %v3061_v0  ;;  %2400 = vmatprep.mubr.msk.f32.mxu1 %vm3062_vm0, %v3061_v0  ;;  %v936_v2 = vld [vmem:[#allocation13 + $0x78] sm:$0xff]  ;;  %v935_v4 = vld [vmem:[#allocation13 + $0x70] sm:$0xff]  ;;  %s3063_s5 = smov 64   ;;  %vm1178_vm2 = vcmask 64512  }
 0x106   : > { %2333 = vmatprep.subr.mxu0 %v845_v1  ;;  %2369 = vmatpush3.msra.mxu1 %v936_v2  ;;  %v934_v6 = vld [vmem:[#allocation13 + $0x68] sm:$0xff]  ;;  %v842_v7 = vld [vmem:[#allocation11 + $0x60] sm:$0xff]  ;;  %v841_v9 = vld [vmem:[#allocation11 + $0x58] sm:$0xff]  ;;  %p814_p4 = scmp.lt.s32.totalorder %s3188_s2, 1  ;;  %s3747_s6 = sld [smem:[#allocation43_spill]] }
 0x107   : > { %2334 = vmatpush3.msra.mxu0 %v845_v1  ;;  %2370 = vmatprep.subr.mxu1 %v3061_v0  ;;  %v933_v8 = vld [vmem:[#allocation13 + $0x60] sm:$0xff]  ;;  %v932_v10 = vld [vmem:[#allocation13 + $0x58] sm:$0xff]  ;;  %v840_v11 = vld [vmem:[#allocation11 + $0x50] sm:$0xff]  ;;  %s3748_s16 = sld [smem:[#allocation45_spill]]  ;;  %s2212_s3 = sshll.u32 %s3188_s2, 8 }
 0x108   : > { %2335 = vmatprep.subr.mxu0 %v844_v3  ;;  %2371 = vmatpush3.msra.mxu1 %v935_v4  ;;  %v931_v12 = vld [vmem:[#allocation13 + $0x50] sm:$0xff]  ;;  %v839_v13 = vld [vmem:[#allocation11 + $0x48] sm:$0xff]  ;;  %v838_v15 = vld [vmem:[#allocation11 + $0x40] sm:$0xff]  ;;  %s815_s0 = scalar_select %p814_p4, %s3188_s2, 1 }
 0x109   : > { %2336 = vmatpush3.msra.mxu0 %v844_v3  ;;  %2372 = vmatprep.subr.mxu1 %v3061_v0  ;;  %v930_v14 = vld [vmem:[#allocation13 + $0x48] sm:$0xff]  ;;  %v929_v16 = vld [vmem:[#allocation13 + $0x40] sm:$0xff]  ;;  %v837_v17 = vld [vmem:[#allocation11 + $0x38] sm:$0xff]  ;;  %s3752_s27 = sld [smem:[#allocation32_spill]]  ;;  %s806_s4 = scalar_lea.vmem [#allocation20], %s2175_s7 }
 0x10a   : > { %2337 = vmatprep.subr.mxu0 %v843_v5  ;;  %2373 = vmatpush3.msra.mxu1 %v934_v6  ;;  %v928_v18 = vld [vmem:[#allocation13 + $0x38] sm:$0xff]  ;;  %v836_v19 = vld [vmem:[#allocation11 + $0x30] sm:$0xff]  ;;  %v835_v21 = vld [vmem:[#allocation11 + $0x28] sm:$0xff]  ;;  %s2211_s17 = sshll.u32 %s815_s0, 5  ;;  %s1934_s22 = sshll.u32 %s806_s4, 4  ;;  %s3600_s22 = int_to_ptr.vmem [resolvable:$true] %s1934_s22 }
 0x10b   : > { %2338 = vmatpush3.msra.mxu0 %v843_v5  ;;  %2374 = vmatprep.subr.mxu1 %v3061_v0  ;;  %v927_v20 = vld [vmem:[#allocation13 + $0x30] sm:$0xff]  ;;  %v926_v22 = vld [vmem:[#allocation13 + $0x28] sm:$0xff]  ;;  %v834_v23 = vld [vmem:[#allocation11 + $0x20] sm:$0xff]  ;;  %s818_s20 = scalar_lea.vmem %s3662_s19, %s2211_s17  ;;  %s3750_s17 = sld [smem:[#allocation47_spill]] }
 0x10c   : > { %2339 = vmatprep.subr.mxu0 %v842_v7  ;;  %2375 = vmatpush3.msra.mxu1 %v933_v8  ;;  %v925_v24 = vld [vmem:[#allocation13 + $0x20] sm:$0xff]  ;;  %v833_v25 = vld [vmem:[#allocation11 + $0x18] sm:$0xff]  ;;  %v832_v27 = vld [vmem:[#allocation11 + $0x10] sm:$0xff]  ;;  %s3064_s2 = smov [#allocation20]  }
 0x10d   : > { %2340 = vmatpush3.msra.mxu0 %v842_v7  ;;  %2376 = vmatprep.subr.mxu1 %v3061_v0  ;;  %v924_v26 = vld [vmem:[#allocation13 + $0x18] sm:$0xff]  ;;  %v923_v28 = vld [vmem:[#allocation13 + $0x10] sm:$0xff]  ;;  %v831_v29 = vld [vmem:[#allocation11 + $0x8] sm:$0xff]  ;;  %s2964_s7 = sshll.u32 %s3064_s2, 4  ;;  %s2965_s7 = int_to_ptr.vmem [resolvable:$false] %s2964_s7 }
 0x10e   : > { %2341 = vmatprep.subr.mxu0 %v841_v9  ;;  %2377 = vmatpush3.msra.mxu1 %v932_v10  ;;  %v922_v30 = vld [vmem:[#allocation13 + $0x8] sm:$0xff]  ;;  %v826_v32 = vld [vmem:[#allocation10] sm:$0xff]  ;;  %v822_v34 = vld [vmem:[%s3444_s26] sm:$0xff]  ;;  %s2966_s23 = scalar_lea.vmem %s2965_s7, 512  ;;  %p2967_p1 = scmp.lt.s32.totalorder %s3600_s22, %s2965_s7 }
 0x10f   : > { %2342 = vmatpush3.msra.mxu0 %v841_v9  ;;  %2378 = vmatprep.subr.mxu1 %v3061_v0  ;;  %v824_v31 = vld [vmem:[%s3453_s11] sm:$0xff]  ;;  %v825_v35 = vld [vmem:[%s3453_s11 + $0x8] sm:$0xff]  ;;  %s3749_s11 = sld [smem:[#allocation46_spill]]  ;;  %p3754_p5 = scmp.ne.s32.totalorder %s3752_s27, 0 }
 0x110   : > { %2343 = vmatprep.subr.mxu0 %v840_v11  ;;  %2379 = vmatpush3.msra.mxu1 %v931_v12  ;;  %v3487_v33 = vld [vmem:[#allocation8] sm:$0xff]  ;;  %v827_v36 = vld [vmem:[#allocation10 + $0x8] sm:$0xff]  ;;  %v830_v37 = vld [vmem:[#allocation11] sm:$0xff]  ;;  %v3493_v39 = vadd.f32 %v826_v32, %v824_v31 }
 0x111   : > { %2344 = vmatpush3.msra.mxu0 %v840_v11  ;;  %2380 = vmatprep.subr.mxu1 %v3061_v0  ;;  %v921_v38 = vld [vmem:[#allocation13] sm:$0xff]  ;;  %v823_v40 = vadd.f32 %v822_v34, %v3487_v33  ;;  %v3496_v41 = vadd.f32 %v827_v36, %v825_v35  ;;  %v1022_v42 = vld [vmem:[#allocation14 + $0x78] sm:$0xff]  ;;  %v1021_v43 = vld [vmem:[#allocation14 + $0x70] sm:$0xff] }
 0x112   : > { %2345 = vmatprep.subr.mxu0 %v839_v13  ;;  %2381 = vmatpush3.msra.mxu1 %v930_v14  ;;  %v1020_v44 = vld [vmem:[#allocation14 + $0x68] sm:$0xff]  ;;  %v1019_v45 = vld [vmem:[#allocation14 + $0x60] sm:$0xff]  ;;  %v1018_v46 = vld [vmem:[#allocation14 + $0x58] sm:$0xff] }
 0x113   : > { %2346 = vmatpush3.msra.mxu0 %v839_v13  ;;  %2382 = vmatprep.subr.mxu1 %v3061_v0  ;;  %v1017_v47 = vld [vmem:[#allocation14 + $0x50] sm:$0xff]  ;;  %v1016_v48 = vld [vmem:[#allocation14 + $0x48] sm:$0xff]  ;;  %v1015_v49 = vld [vmem:[#allocation14 + $0x40] sm:$0xff] }
 0x114   : > { %2347 = vmatprep.subr.mxu0 %v838_v15  ;;  %2383 = vmatpush3.msra.mxu1 %v929_v16  ;;  %v1014_v50 = vld [vmem:[#allocation14 + $0x38] sm:$0xff]  ;;  %v1013_v51 = vld [vmem:[#allocation14 + $0x30] sm:$0xff]  ;;  %v1012_v52 = vld [vmem:[#allocation14 + $0x28] sm:$0xff] }
 0x115   : > { %2348 = vmatpush3.msra.mxu0 %v838_v15  ;;  %2384 = vmatprep.subr.mxu1 %v3061_v0  ;;  %v1011_v53 = vld [vmem:[#allocation14 + $0x20] sm:$0xff]  ;;  %v1010_v54 = vld [vmem:[#allocation14 + $0x18] sm:$0xff]  ;;  %v1009_v55 = vld [vmem:[#allocation14 + $0x10] sm:$0xff] }
 0x116   : > { %2349 = vmatprep.subr.mxu0 %v837_v17  ;;  %2385 = vmatpush3.msra.mxu1 %v928_v18  ;;  %v1008_v56 = vld [vmem:[#allocation14 + $0x8] sm:$0xff]  ;;  %v1007_v59 = vld [vmem:[#allocation14] sm:$0xff] }
 0x117   : > { %2350 = vmatpush3.msra.mxu0 %v837_v17  ;;  %2386 = vmatprep.subr.mxu1 %v3061_v0  ;;  %v819_v57 = vld [vmem:[%s3437_s28] sm:$0xff]  ;;  %s1916_s28 = scalar_lea.sflag [#allocation4], %s3433_s13 }
 0x118   : > { %2351 = vmatprep.subr.mxu0 %v836_v19  ;;  %2387 = vmatpush3.msra.mxu1 %v927_v20  ;;  %v821_v58 = vadd.f32 %v3487_v33, %v819_v57  ;;  %v1498_v57 = vld [vmem:[#allocation16 + $0x38] sm:$0xff] }
 0x119   : > { %2352 = vmatpush3.msra.mxu0 %v836_v19  ;;  %2388 = vmatprep.subr.mxu1 %v3061_v0 }
 0x11a   : > { %2353 = vmatprep.subr.mxu0 %v835_v21  ;;  %2389 = vmatpush3.msra.mxu1 %v926_v22 }
 0x11b   : > { %2354 = vmatpush3.msra.mxu0 %v835_v21  ;;  %2390 = vmatprep.subr.mxu1 %v3061_v0 }
 0x11c   : > { %2355 = vmatprep.subr.mxu0 %v834_v23  ;;  %2391 = vmatpush3.msra.mxu1 %v925_v24 }
 0x11d   : > { %2356 = vmatpush3.msra.mxu0 %v834_v23  ;;  %2392 = vmatprep.subr.mxu1 %v3061_v0 }
 0x11e   : > { %2357 = vmatprep.subr.mxu0 %v833_v25  ;;  %2393 = vmatpush3.msra.mxu1 %v924_v26 }
 0x11f   : > { %2358 = vmatpush3.msra.mxu0 %v833_v25  ;;  %2394 = vmatprep.subr.mxu1 %v3061_v0 }
 0x120   : > { %2359 = vmatprep.subr.mxu0 %v832_v27  ;;  %2395 = vmatpush3.msra.mxu1 %v923_v28 }
 0x121   : > { %2360 = vmatpush3.msra.mxu0 %v832_v27  ;;  %2396 = vmatprep.subr.mxu1 %v3061_v0 }
 0x122   : > { %2361 = vmatprep.subr.mxu0 %v831_v29  ;;  %2397 = vmatpush3.msra.mxu1 %v922_v30 }
 0x123   : > { %2362 = vmatpush3.msra.mxu0 %v831_v29  ;;  %2398 = vmatprep.subr.mxu1 %v3061_v0 }
 0x124   : > { %2363 = vmatprep.subr.mxu0 %v830_v37  ;;  %2399 = vmatpush3.msra.mxu1 %v921_v38 }
 0x125   : > { %2364 = vmatpush3.msra.mxu0 %v830_v37  ;;  %2365 = vmatprep.mubr.f32.mxu0 %v3493_v39 }
 0x126   : > { %2401 = vmatmul.mubr.f32.vlgmr.msra.gmra.mxu1 %v823_v40  ;;  %2366 = vmatmul.mubr.f32.vlgmr.msra.gmra.mxu0 %v3496_v41 }
 0x127   : > { %2403 = vmatprep.subr.mxu0 %v3061_v0  ;;  %2435 = vmatprep.mubr.msk.f32.mxu0 %vm3062_vm0, %v3061_v0 }
 0x128   : > { %2404 = vmatpush3.msra.mxu0 %v1022_v42 }
 0x129   : > { %2405 = vmatprep.subr.mxu0 %v3061_v0 }
 0x12a   : > { %2406 = vmatpush3.msra.mxu0 %v1021_v43 }
 0x12b   : > { %2407 = vmatprep.subr.mxu0 %v3061_v0 }
 0x12c   : > { %2408 = vmatpush3.msra.mxu0 %v1020_v44 }
 0x12d   : > { %2409 = vmatprep.subr.mxu0 %v3061_v0 }
 0x12e   : > { %2410 = vmatpush3.msra.mxu0 %v1019_v45 }
 0x12f   : > { %2411 = vmatprep.subr.mxu0 %v3061_v0 }
 0x130   : > { %2412 = vmatpush3.msra.mxu0 %v1018_v46 }
 0x131   : > { %2413 = vmatprep.subr.mxu0 %v3061_v0 }
 0x132   : > { %2414 = vmatpush3.msra.mxu0 %v1017_v47 }
 0x133   : > { %2415 = vmatprep.subr.mxu0 %v3061_v0 }
 0x134   : > { %2416 = vmatpush3.msra.mxu0 %v1016_v48 }
 0x135   : > { %2417 = vmatprep.subr.mxu0 %v3061_v0 }
 0x136   : > { %2418 = vmatpush3.msra.mxu0 %v1015_v49  ;;  %v1506_v49 = vld [vmem:[#allocation16 + $0x78] sm:$0xff] }
 0x137   : > { %2419 = vmatprep.subr.mxu0 %v3061_v0 }
 0x138   : > { %2420 = vmatpush3.msra.mxu0 %v1014_v50  ;;  %v1505_v50 = vld [vmem:[#allocation16 + $0x70] sm:$0xff] }
 0x139   : > { %2421 = vmatprep.subr.mxu0 %v3061_v0 }
 0x13a   : > { %2422 = vmatpush3.msra.mxu0 %v1013_v51  ;;  %v1504_v51 = vld [vmem:[#allocation16 + $0x68] sm:$0xff] }
 0x13b   : > { %2423 = vmatprep.subr.mxu0 %v3061_v0 }
 0x13c   : > { %2424 = vmatpush3.msra.mxu0 %v1012_v52  ;;  %v1503_v52 = vld [vmem:[#allocation16 + $0x60] sm:$0xff] }
 0x13d   : > { %2425 = vmatprep.subr.mxu0 %v3061_v0 }
 0x13e   : > { %2426 = vmatpush3.msra.mxu0 %v1011_v53  ;;  %v1502_v53 = vld [vmem:[#allocation16 + $0x58] sm:$0xff] }
 0x13f   : > { %2427 = vmatprep.subr.mxu0 %v3061_v0 }
 0x140   : > { %2428 = vmatpush3.msra.mxu0 %v1010_v54  ;;  %v1501_v54 = vld [vmem:[#allocation16 + $0x50] sm:$0xff] }
 0x141   : > { %2429 = vmatprep.subr.mxu0 %v3061_v0 }
 0x142   : > { %2430 = vmatpush3.msra.mxu0 %v1009_v55  ;;  %v1500_v55 = vld [vmem:[#allocation16 + $0x48] sm:$0xff] }
 0x143   : > { %2431 = vmatprep.subr.mxu0 %v3061_v0 }
 0x144   : > { %2432 = vmatpush3.msra.mxu0 %v1008_v56  ;;  %v1499_v56 = vld [vmem:[#allocation16 + $0x40] sm:$0xff] }
 0x145   : > { %2433 = vmatprep.subr.mxu0 %v3061_v0 }
 0x146   : > { %2434 = vmatpush3.msra.mxu0 %v1007_v59  ;;  %v1496_v59 = vld [vmem:[#allocation16 + $0x28] sm:$0xff] }
 0x147   : > { %2436 = vmatmul.mubr.f32.vlgmr.msra.gmra.mxu0 %v821_v58  ;;  %v1497_v58 = vld [vmem:[#allocation16 + $0x30] sm:$0xff] }
 0x1e6   : > { %v1003_v60 = vpop.f32.mrf.mxu1  ;;  %v2367_v61 = vpop.f32.mrf.mxu0 }
 0x1e7   : > { %1288 = vrot.lane.b32.xlu0 %v1003_v60, %s3063_s5  ;;  %2438 = vmatprep.subr.msk.mxu0 %vm1093_vm1, %v1003_v60 }
 0x1e8   : > { %v2402_v62 = vpop.f32.mrf.mxu1  ;;  %2439 = vmatpush3.xpose.msk.msra.mxu0 %vm1093_vm1, %v1003_v60  ;;  %1286 = vrot.lane.b32.xlu1 %v2367_v61, %s3063_s5  ;;  %v912_v63 = vpop.f32.mrf.mxu0  ;;  %v1495_v60 = vld [vmem:[#allocation16 + $0x20] sm:$0xff] }
 0x1e9   : > { %2440 = vmatprep.mubr.msk.f32.mxu0 %vm1093_vm1, %v912_v63  ;;  %v1493_v62 = vld [vmem:[#allocation16 + $0x10] sm:$0xff] }
 0x1eb   : > { %1284 = vrot.lane.b32.xlu0 %v912_v63, %s3063_s5  ;;  %2441 = vmatmul.mubr.msk.f32.vlgmr.msra.gmra.mxu0 %vm1093_vm1, %v2367_v61  ;;  %v1494_v61 = vld [vmem:[#allocation16 + $0x18] sm:$0xff]  ;;  %v1492_v63 = vld [vmem:[#allocation16 + $0x8] sm:$0xff] }
 0x207   : > { %v1089_v1 = vpop.f32.mrf.mxu0 }
 0x208   : > { %2443 = vmatprep.subr.mxu0 %v1089_v1 }
 0x209   : > { %v2437_v2 = vpop.f32.mrf.mxu0  ;;  %2444 = vmatpush3.msra.mxu0 %v1089_v1 }
 0x259   : > { %v1289_v3 = vpop.permute.xlu0 %1288 }
 0x25a   : > { %2448 = vmatprep.subr.msk.mxu1 %vm1093_vm1, %v1289_v3  ;;  %v1287_v5 = vpop.permute.xlu1 %1286 }
 0x25b   : > { %2449 = vmatpush3.xpose.msk.msra.mxu1 %vm1093_vm1, %v1289_v3 }
 0x25d   : > { %v1285_v4 = vpop.permute.xlu0 %1284 }
 0x25e   : > { %2450 = vmatprep.mubr.msk.f32.mxu1 %vm1093_vm1, %v1285_v4 }
 0x25f   : > { %2451 = vmatmul.mubr.msk.f32.vlgmr.msra.gmra.mxu1 %vm1093_vm1, %v1287_v5 }
 0x2ab   : > { %v2442_v6 = vpop.f32.mrf.mxu0 }
 0x2ac   : > { %v1182_v13 = vsel %vm1178_vm2, %v2442_v6, -inf }
 0x2ad   : > { %v1169_v9 = vpop.f32.mrf.mxu0 }
 0x2ae   : > { %v1179_v12 = vsel %vm1178_vm2, %v1169_v9, -inf }
 0x31f   : > { %v2452_v7 = vpop.f32.mrf.mxu1 }
 0x320   : > { %v1374_v8 = vsel %vm1178_vm2, %v2452_v7, -inf }
 0x321   : > { %1375 = vmax.xlane.f32.xlu0 %v1374_v8  ;;  %v1362_v10 = vpop.f32.mrf.mxu1 }
 0x322   : > { %v1371_v11 = vsel %vm1178_vm2, %v1362_v10, -inf }
 0x323   : > { %1372 = vmax.xlane.f32.xlu1 %v1371_v11 }
 0x325   : > { %1180 = vmax.xlane.f32.xlu0 %v1179_v12  ;;  %v2199_v12 = vld [vmem:[%s3652_s9] ss:$0 sm:$0xff] }
 0x327   : > { %1183 = vmax.xlane.f32.xlu1 %v1182_v13 }
 0x3aa   : > { %v1376_v14 = vpop.xlane.xlu0 %1375 }
 0x3ab   : > { %v1378_v15 = vsub.f32 %v2452_v7, %v1376_v14 }
 0x3ac   : > { %v1373_v16 = vpop.xlane.xlu1 %1372 }
 0x3ad   : > { %v1381_v17 = vmul.f32 1.442695, %v1378_v15  ;;  %v1377_v18 = vsub.f32 %v1362_v10, %v1373_v16 }
 0x3ae   : > { %v1181_v19 = vpop.xlane.xlu0 %1180 }
 0x3af   : > { %2644 = vpow2.f32 %v1381_v17  ;;  %v1379_v20 = vmul.f32 1.442695, %v1377_v18  ;;  %v1185_v21 = vsub.f32 %v1169_v9, %v1181_v19  ;;  %v1663_v19 = vld [vmem:[#allocation17 + $0xf8] sm:$0xff] }
 0x3b0   : > { %v1184_v22 = vpop.xlane.xlu1 %1183  ;;  %1676 = vmatprep.subr.mxu0 %v1663_v19  ;;  %v1761_v19 = vld [vmem:[#allocation19 + $0x20] sm:$0xff] }
 0x3b1   : > { %2646 = vpow2.f32 %v1379_v20  ;;  %v1187_v23 = vmul.f32 1.442695, %v1185_v21  ;;  %v1186_v24 = vsub.f32 %v2442_v6, %v1184_v22  ;;  %v1662_v20 = vld [vmem:[#allocation17 + $0xf0] sm:$0xff]  ;;  %v1661_v21 = vld [vmem:[#allocation17 + $0xe8] sm:$0xff]  ;;  %v1660_v22 = vld [vmem:[#allocation17 + $0xe0] sm:$0xff] }
 0x3b3   : > { %2648 = vpow2.f32 %v1187_v23  ;;  %v1189_v25 = vmul.f32 1.442695, %v1186_v24  ;;  %v1659_v23 = vld [vmem:[#allocation17 + $0xd8] sm:$0xff]  ;;  %v1658_v24 = vld [vmem:[#allocation17 + $0xd0] sm:$0xff] }
 0x3b5   : > { %2650 = vpow2.f32 %v1189_v25  ;;  %v1657_v25 = vld [vmem:[#allocation17 + $0xc8] sm:$0xff] }
 0x3bc   : > { %v2645_v26 = vpop.eup %2644 }
 0x3bd   : > { %v1386_v27 = vsel %vm1178_vm2, %v2645_v26, 0.0 }
 0x3be   : > { %v2647_v28 = vpop.eup %2646  ;;  %1387 = vadd.xlane.f32.xlu1 %v1386_v27 }
 0x3bf   : > { %v1383_v29 = vsel %vm1178_vm2, %v2647_v28, 0.0 }
 0x3c0   : > { %v2649_v30 = vpop.eup %2648  ;;  %1384 = vadd.xlane.f32.xlu0 %v1383_v29 }
 0x3c1   : > { %v1191_v31 = vsel %vm1178_vm2, %v2649_v30, 0.0 }
 0x3c2   : > { %v2651_v32 = vpop.eup %2650  ;;  %1192 = vadd.xlane.f32.xlu1 %v1191_v31 }
 0x3c3   : > { %v1194_v33 = vsel %vm1178_vm2, %v2651_v32, 0.0 }
 0x3c6   : > { %1195 = vadd.xlane.f32.xlu1 %v1194_v33  ;;  %v1655_v33 = vld [vmem:[#allocation17 + $0xb8] sm:$0xff] }
 0x3d6   : > { %1397 = vrot.lane.b32.xlu0 %v1089_v1, %s3063_s5  ;;  %v1491_v1 = vld [vmem:[#allocation16] sm:$0xff] }
 0x447   : > { %v1388_v34 = vpop.xlane.xlu1 %1387 }
 0x448   : > { %2652 = vrcp.f32 %v1388_v34  ;;  %v1654_v34 = vld [vmem:[#allocation17 + $0xb0] sm:$0xff] }
 0x449   : > { %v1385_v35 = vpop.xlane.xlu0 %1384 }
 0x44a   : > { %2654 = vrcp.f32 %v1385_v35  ;;  %v1653_v35 = vld [vmem:[#allocation17 + $0xa8] sm:$0xff] }
 0x44b   : > { %v1193_v36 = vpop.xlane.xlu1 %1192 }
 0x44c   : > { %2656 = vrcp.f32 %v1193_v36  ;;  %v1652_v36 = vld [vmem:[#allocation17 + $0xa0] sm:$0xff] }
 0x44d   : > { %v1398_v37 = vpop.permute.xlu0 %1397 }
 0x44e   : > { %2453 = vmatprep.subr.mxu1 %v1398_v37 }
 0x44f   : > { %v1196_v38 = vpop.xlane.xlu1 %1195  ;;  %2454 = vmatpush3.msra.mxu1 %v1398_v37  ;;  %v1651_v37 = vld [vmem:[#allocation17 + $0x98] sm:$0xff] }
 0x450   : > { %2658 = vrcp.f32 %v1196_v38  ;;  %2458 = vmatprep.subr.mxu1 %v1506_v49  ;;  %v1650_v38 = vld [vmem:[#allocation17 + $0x90] sm:$0xff] }
 0x455   : > { %v2653_v40 = vpop.eup %2652 }
 0x456   : > { %v1392_v42 = vmul.f32 %v2653_v40, %v2645_v26  ;;  %v1656_v26 = vld [vmem:[#allocation17 + $0xc0] sm:$0xff]  ;;  %v1649_v40 = vld [vmem:[#allocation17 + $0x88] sm:$0xff] }
 0x457   : > { %v2655_v43 = vpop.eup %2654 }
 0x458   : > { %v1390_v44 = vmul.f32 %v2655_v43, %v2647_v28  ;;  %2196 = vst.msk [vmem:[%s818_s20 + $0x18] sm:$0xff] %vm1178_vm2, %v1392_v42  ;;  %v1647_v43 = vld [vmem:[#allocation17 + $0x78] sm:$0xff] }
 0x459   : > { %v2657_v45 = vpop.eup %2656 }
 0x45a   : > { %2195 = vst.msk [vmem:[%s818_s20 + $0x10] sm:$0xff] %vm1178_vm2, %v1390_v44  ;;  %2455 = vmatprep.mubr.msk.f32.mxu1 %vm1178_vm2, %v1390_v44  ;;  %v1198_v46 = vmul.f32 %v2657_v45, %v2649_v30  ;;  %v1646_v44 = vld [vmem:[#allocation17 + $0x70] sm:$0xff]  ;;  %v1645_v45 = vld [vmem:[#allocation17 + $0x68] sm:$0xff] }
 0x45b   : > { %2456 = vmatmul.mubr.msk.f32.vlgmr.msra.gmra.mxu1 %vm1178_vm2, %v1392_v42  ;;  %v1648_v42 = vld [vmem:[#allocation17 + $0x80] sm:$0xff] }
 0x45c   : > { %1201 = vst.msk [vmem:[%s818_s20] sm:$0xff] %vm1178_vm2, %v1198_v46  ;;  %2445 = vmatprep.mubr.msk.f32.mxu0 %vm1178_vm2, %v1198_v46  ;;  %2459 = vmatpush3.msra.mxu1 %v1506_v49  ;;  %v1644_v46 = vld [vmem:[#allocation17 + $0x60] sm:$0xff]  ;;  %v1641_v49 = vld [vmem:[#allocation17 + $0x48] sm:$0xff] }
 0x45d   : > { %v2659_v47 = vpop.eup %2658  ;;  %2460 = vmatprep.subr.mxu1 %v1505_v50 }
 0x45e   : > { %v1200_v48 = vmul.f32 %v2659_v47, %v2651_v32  ;;  %2461 = vmatpush3.msra.mxu1 %v1505_v50  ;;  %v1643_v47 = vld [vmem:[#allocation17 + $0x58] sm:$0xff]  ;;  %v1640_v50 = vld [vmem:[#allocation17 + $0x40] sm:$0xff] }
 0x45f   : > { %2462 = vmatprep.subr.mxu1 %v1504_v51 }
 0x460   : > { %1202 = vst.msk [vmem:[%s818_s20 + $0x8] sm:$0xff] %vm1178_vm2, %v1200_v48  ;;  %2446 = vmatmul.mubr.msk.f32.vlgmr.msra.gmra.mxu0 %vm1178_vm2, %v1200_v48  ;;  %2463 = vmatpush3.msra.mxu1 %v1504_v51  ;;  %v1642_v48 = vld [vmem:[#allocation17 + $0x50] sm:$0xff]  ;;  %v1639_v51 = vld [vmem:[#allocation17 + $0x38] sm:$0xff]  ;;  %s3751_s20 = sld [smem:[#allocation48_spill]] }
 0x461   : > { %1740 = vmatprep.mubr.f32.mxu0 %v3061_v0  ;;  %2464 = vmatprep.subr.mxu1 %v1503_v52 }
 0x462   : > { %2465 = vmatpush3.msra.mxu1 %v1503_v52  ;;  %1677 = vmatpush1.msra.mxu0 %v1662_v20  ;;  %v1638_v52 = vld [vmem:[#allocation17 + $0x30] sm:$0xff] }
 0x463   : > { %2466 = vmatprep.subr.mxu1 %v1502_v53  ;;  %1678 = vmatprep.subr.mxu0 %v1661_v21 }
 0x464   : > { %2467 = vmatpush3.msra.mxu1 %v1502_v53  ;;  %1679 = vmatpush1.msra.mxu0 %v1660_v22  ;;  %v1637_v53 = vld [vmem:[#allocation17 + $0x28] sm:$0xff] }
 0x465   : > { %2468 = vmatprep.subr.mxu1 %v1501_v54  ;;  %1680 = vmatprep.subr.mxu0 %v1659_v23 }
 0x466   : > { %2469 = vmatpush3.msra.mxu1 %v1501_v54  ;;  %1681 = vmatpush1.msra.mxu0 %v1658_v24  ;;  %v1636_v54 = vld [vmem:[#allocation17 + $0x20] sm:$0xff] }
 0x467   : > { %2470 = vmatprep.subr.mxu1 %v1500_v55  ;;  %1682 = vmatprep.subr.mxu0 %v1657_v25 }
 0x468   : > { %2471 = vmatpush3.msra.mxu1 %v1500_v55  ;;  %1683 = vmatpush1.msra.mxu0 %v1656_v26  ;;  %v1635_v55 = vld [vmem:[#allocation17 + $0x18] sm:$0xff] }
 0x469   : > { %2472 = vmatprep.subr.mxu1 %v1499_v56  ;;  %1684 = vmatprep.subr.mxu0 %v1655_v33 }
 0x46a   : > { %2473 = vmatpush3.msra.mxu1 %v1499_v56  ;;  %1685 = vmatpush1.msra.mxu0 %v1654_v34  ;;  %v1634_v56 = vld [vmem:[#allocation17 + $0x10] sm:$0xff] }
 0x46b   : > { %2474 = vmatprep.subr.mxu1 %v1498_v57  ;;  %1686 = vmatprep.subr.mxu0 %v1653_v35 }
 0x46c   : > { %2475 = vmatpush3.msra.mxu1 %v1498_v57  ;;  %1687 = vmatpush1.msra.mxu0 %v1652_v36  ;;  %v1633_v57 = vld [vmem:[#allocation17 + $0x8] sm:$0xff]  ;;  %v1776_v36 = vld [vmem:[#allocation19 + $0x98] sm:$0xff] }
 0x46d   : > { %2476 = vmatprep.subr.mxu1 %v1497_v58  ;;  %1688 = vmatprep.subr.mxu0 %v1651_v37  ;;  %v1760_v37 = vld [vmem:[#allocation19 + $0x18] sm:$0xff] }
 0x46e   : > { %2477 = vmatpush3.msra.mxu1 %v1497_v58  ;;  %1689 = vmatpush1.msra.mxu0 %v1650_v38  ;;  %v1632_v58 = vld [vmem:[#allocation17] sm:$0xff]  ;;  %v1759_v38 = vld [vmem:[#allocation19 + $0x10] sm:$0xff] }
 0x46f   : > { %2478 = vmatprep.subr.mxu1 %v1496_v59  ;;  %1690 = vmatprep.subr.mxu0 %v1649_v40  ;;  %v1774_v40 = vld [vmem:[#allocation19 + $0x88] sm:$0xff] }
 0x470   : > { %2479 = vmatpush3.msra.mxu1 %v1496_v59  ;;  %1691 = vmatpush1.msra.mxu0 %v1648_v42  ;;  %v1788_v59 = vld [vmem:[#allocation19 + $0xf8] sm:$0xff]  ;;  %v1758_v42 = vld [vmem:[#allocation19 + $0x8] sm:$0xff] }
 0x471   : > { %2480 = vmatprep.subr.mxu1 %v1495_v60  ;;  %1692 = vmatprep.subr.mxu0 %v1647_v43  ;;  %v1773_v43 = vld [vmem:[#allocation19 + $0x80] sm:$0xff] }
 0x472   : > { %2481 = vmatpush3.msra.mxu1 %v1495_v60  ;;  %1693 = vmatpush1.msra.mxu0 %v1646_v44  ;;  %v1772_v60 = vld [vmem:[#allocation19 + $0x78] sm:$0xff]  ;;  %v1666_v44 = vlaneseq }
 0x473   : > { %2482 = vmatprep.subr.mxu1 %v1494_v61  ;;  %1694 = vmatprep.subr.mxu0 %v1645_v45 }
 0x474   : > { %2483 = vmatpush3.msra.mxu1 %v1494_v61  ;;  %1695 = vmatpush1.msra.mxu0 %v1644_v46  ;;  %v1787_v61 = vld [vmem:[#allocation19 + $0xf0] sm:$0xff]  ;;  %v1664_v46 = vld [vmem:[%s3748_s16] sm:$0x3]  ;;  %s2960_s16 = scalar_lea.vmem %s3600_s22, 256 }
 0x475   : > { %2484 = vmatprep.subr.mxu1 %v1493_v62  ;;  %1696 = vmatprep.subr.mxu0 %v1643_v47  ;;  %p2961_p11 = scmp.ne.s32.totalorder %s3600_s22, %s2960_s16  ;;  %p2968_p10 = scmp.lt.s32.totalorder %s2966_s23, %s2960_s16 }
 0x476   : > { %2485 = vmatpush3.msra.mxu1 %v1493_v62  ;;  %1697 = vmatpush1.msra.mxu0 %v1642_v48  ;;  %v1771_v62 = vld [vmem:[#allocation19 + $0x70] sm:$0xff] }
 0x477   : > { %2486 = vmatprep.subr.mxu1 %v1492_v63  ;;  %1698 = vmatprep.subr.mxu0 %v1641_v49  ;;  %p2962_p13 = pnand %p2961_p11, %p3754_p5  ;;  %p2969_p3 = por %p2968_p10, %p2967_p1 }
 0x478   : > { %2487 = vmatpush3.msra.mxu1 %v1492_v63  ;;  %1699 = vmatpush1.msra.mxu0 %v1640_v50  ;;  %v1786_v63 = vld [vmem:[#allocation19 + $0xe8] sm:$0xff] }
 0x479   : > { %2488 = vmatprep.subr.mxu1 %v1491_v1  ;;  %1700 = vmatprep.subr.mxu0 %v1639_v51  ;;  %p2963_p12 = pneg %p2962_p13 }
 0x47a   : > { %2489 = vmatpush3.msra.mxu1 %v1491_v1  ;;  %1701 = vmatpush1.msra.mxu0 %v1638_v52  ;;  %v1770_v1 = vld [vmem:[#allocation19 + $0x68] sm:$0xff] }
 0x47b   : > { %1702 = vmatprep.subr.mxu0 %v1637_v53  ;;  %2295 = vmatprep.subr.mxu1 %v1788_v59  ;;  %p2970_p6 = pnand %p2969_p3, %p2963_p12 }
 0x47c   : > { %1703 = vmatpush1.msra.mxu0 %v1636_v54 }
 0x47d   : > { %1704 = vmatprep.subr.mxu0 %v1635_v55 }
 0x47e   : > { %1705 = vmatpush1.msra.mxu0 %v1634_v56 }
 0x47f   : > { %1706 = vmatprep.subr.mxu0 %v1633_v57 }
 0x480   : > { %1707 = vmatpush1.msra.mxu0 %v1632_v58 }
 0x51b   : > { %v2457_v2 = vpop.f32.mrf.mxu1 }
 0x51d   : > { %v1472_v3 = vpop.f32.mrf.mxu1 }
 0x51e   : > { %v2639_v4 = vpack.i.bf16 %v2457_v2, %v1472_v3  ;;  %v1785_v2 = vld [vmem:[#allocation19 + $0xe0] sm:$0xff] }
 0x51f   : > { %v1769_v3 = vld [vmem:[#allocation19 + $0x60] sm:$0xff] }
 0x520   : > { %2640 = vrot.lane.b32.xlu1 %v2639_v4, %s3063_s5  ;;  %v2447_v5 = vpop.f32.mrf.mxu0  ;;  %v1784_v4 = vld [vmem:[#allocation19 + $0xd8] sm:$0xff] }
 0x522   : > { %v1275_v9 = vpop.f32.mrf.mxu0 }
 0x592   : > { %v2641_v6 = vpop.permute.xlu1 %2640 }
 0x593   : > { %v2643_v7 = vunpack.i.h.bf16 %v2641_v6  ;;  %v2642_v8 = vunpack.i.l.bf16 %v2641_v6  ;;  %v1783_v6 = vld [vmem:[#allocation19 + $0xd0] sm:$0xff] }
 0x595   : > { %v1489_v10 = vsel %vm1093_vm1, %v1275_v9, %v2642_v8  ;;  %v1490_v11 = vsel %vm1093_vm1, %v2447_v5, %v2643_v7  ;;  %v1768_v5 = vld [vmem:[#allocation19 + $0x58] sm:$0xff]  ;;  %v1767_v7 = vld [vmem:[#allocation19 + $0x50] sm:$0xff]  ;;  %v1782_v8 = vld [vmem:[#allocation19 + $0xc8] sm:$0xff] }
 0x596   : > { %2490 = vmatprep.mubr.f32.mxu1 %v1489_v10  ;;  %v1766_v9 = vld [vmem:[#allocation19 + $0x48] sm:$0xff]  ;;  %v1781_v10 = vld [vmem:[#allocation19 + $0xc0] sm:$0xff] }
 0x597   : > { %2491 = vmatmul.mubr.f32.vlgmr.msra.gmra.mxu1 %v1490_v11  ;;  %v1765_v11 = vld [vmem:[#allocation19 + $0x40] sm:$0xff] }
 0x598   : > { %2296 = vmatpush3.msra.mxu1 %v1772_v60 }
 0x599   : > { %2297 = vmatprep.subr.mxu1 %v1787_v61 }
 0x59a   : > { %2298 = vmatpush3.msra.mxu1 %v1771_v62 }
 0x59b   : > { %2299 = vmatprep.subr.mxu1 %v1786_v63  ;;  %v2202_v63 = vld [vmem:[%s3749_s11] ss:$0 sm:$0xff] }
 0x59c   : > { %2300 = vmatpush3.msra.mxu1 %v1770_v1 }
 0x59d   : > { %2301 = vmatprep.subr.mxu1 %v1785_v2 }
 0x59e   : > { %2302 = vmatpush3.msra.mxu1 %v1769_v3 }
 0x59f   : > { %2303 = vmatprep.subr.mxu1 %v1784_v4 }
 0x5a0   : > { %2304 = vmatpush3.msra.mxu1 %v1768_v5 }
 0x5a1   : > { %2305 = vmatprep.subr.mxu1 %v1783_v6 }
 0x5a2   : > { %2306 = vmatpush3.msra.mxu1 %v1767_v7 }
 0x5a3   : > { %2307 = vmatprep.subr.mxu1 %v1782_v8 }
 0x5a4   : > { %2308 = vmatpush3.msra.mxu1 %v1766_v9 }
 0x5a5   : > { %2309 = vmatprep.subr.mxu1 %v1781_v10 }
 0x5a6   : > { %2310 = vmatpush3.msra.mxu1 %v1765_v11 }
 0x657   : > { %v2492_v13 = vpop.f32.mrf.mxu1 }
 0x658   : > { %v1586_v14 = vadd.f32 %v2492_v13, %v2199_v12  ;;  %v1764_v13 = vld [vmem:[#allocation19 + $0x38] sm:$0xff] }
 0x659   : > { %v1580_v15 = vpop.f32.mrf.mxu1 }
 0x65a   : > { %v1581_v16 = vadd.f32 %v2199_v12, %v1580_v15  ;;  %v1590_v17 = vadd.f32 %v1586_v14, %v3496_v41  ;;  %v1780_v12 = vld [vmem:[#allocation19 + $0xb8] sm:$0xff]  ;;  %v1779_v14 = vld [vmem:[#allocation19 + $0xb0] sm:$0xff] }
 0x65b   : > { %2311 = vmatprep.subr.mxu1 %v1780_v12  ;;  %v1763_v15 = vld [vmem:[#allocation19 + $0x30] sm:$0xff] }
 0x65c   : > { %1595 = vadd.xlane.f32.xlu1 %v1590_v17  ;;  %v1589_v18 = vadd.f32 %v1581_v16, %v3493_v39  ;;  %2312 = vmatpush3.msra.mxu1 %v1764_v13  ;;  %v1778_v16 = vld [vmem:[#allocation19 + $0xa8] sm:$0xff] }
 0x65d   : > { %2313 = vmatprep.subr.mxu1 %v1779_v14 }
 0x65e   : > { %1593 = vadd.xlane.f32.xlu0 %v1589_v18  ;;  %2314 = vmatpush3.msra.mxu1 %v1763_v15 }
 0x65f   : > { %2315 = vmatprep.subr.mxu1 %v1778_v16 }
 0x6e5   : > { %v1596_v41 = vpop.xlane.xlu1 %1595 }
 0x6e6   : > { %v1599_v39 = vmul.f32 0.0078125, %v1596_v41  ;;  %v2200_v41 = vld [vmem:[%s3653_s10] ss:$0 sm:$0xff] }
 0x6e7   : > { %v1594_v27 = vpop.xlane.xlu0 %1593 }
 0x6e8   : > { %v1598_v28 = vmul.f32 0.0078125, %v1594_v27  ;;  %v3565_v30 = vsub.f32 %v1590_v17, %v1599_v39  ;;  %v1762_v17 = vld [vmem:[#allocation19 + $0x28] sm:$0xff] }
 0x6e9   : > { %2316 = vmatpush3.msra.mxu1 %v1762_v17  ;;  %v2201_v39 = vld [vmem:[%s3747_s6] ss:$0 sm:$0xff]  ;;  %s3753_s6 = sld [smem:[#allocation49_spill]] }
 0x6ea   : > { %v3563_v29 = vsub.f32 %v1589_v18, %v1598_v28  ;;  %v1603_v32 = vmul.f32 %v3565_v30, %v3565_v30  ;;  %v1777_v18 = vld [vmem:[#allocation19 + $0xa0] sm:$0xff] }
 0x6eb   : > { %2317 = vmatprep.subr.mxu1 %v1777_v18 }
 0x6ec   : > { %v1602_v31 = vmul.f32 %v3563_v29, %v3563_v29  ;;  %2318 = vmatpush3.msra.mxu1 %v1761_v19 }
 0x6ed   : > { %2319 = vmatprep.subr.mxu1 %v1776_v36 }
 0x6ee   : > { %1604 = vadd.xlane.f32.xlu0 %v1602_v31  ;;  %2320 = vmatpush3.msra.mxu1 %v1760_v37 }
 0x6ef   : > { %s3598_s8 = scalar_lea.hbm %s3753_s6, %s2212_s3 }
 0x6f2   : > { %1606 = vadd.xlane.f32.xlu0 %v1603_v32 }
 0x777   : > { %v1605_v20 = vpop.xlane.xlu0 %1604 }
 0x778   : > { %v1608_v21 = vmul.f32 0.0078125, %v1605_v20 }
 0x77a   : > { %v1610_v22 = vadd.f32 1e-05, %v1608_v21 }
 0x77b   : > { %v1607_v23 = vpop.xlane.xlu0 %1606 }
 0x77c   : > { %2660 = vrsqrt.f32 %v1610_v22  ;;  %v1609_v24 = vmul.f32 0.0078125, %v1607_v23 }
 0x77e   : > { %v1611_v25 = vadd.f32 1e-05, %v1609_v24 }
 0x780   : > { %2662 = vrsqrt.f32 %v1611_v25  ;;  %v2203_v25 = vld [vmem:[%s3750_s17] ss:$0 sm:$0xff] }
 0x789   : > { %v2661_v26 = vpop.eup %2660 }
 0x78a   : > { %v1614_v27 = vmul.f32 %v2661_v26, %v3563_v29  ;;  %v1775_v29 = vld [vmem:[#allocation19 + $0x90] sm:$0xff] }
 0x78b   : > { %2321 = vmatprep.subr.mxu1 %v1775_v29 }
 0x78c   : > { %v1622_v28 = vmul.f32 %v2200_v41, %v1614_v27  ;;  %2322 = vmatpush3.msra.mxu1 %v1759_v38 }
 0x78d   : > { %v2663_v31 = vpop.eup %2662  ;;  %2323 = vmatprep.subr.mxu1 %v1774_v40 }
 0x78e   : > { %v1630_v32 = vadd.f32 %v2201_v39, %v1622_v28  ;;  %v1615_v33 = vmul.f32 %v2663_v31, %v3565_v30  ;;  %2324 = vmatpush3.msra.mxu1 %v1758_v42  ;;  %v1757_v30 = vld [vmem:[#allocation19] sm:$0xff] }
 0x78f   : > { %2325 = vmatprep.subr.mxu1 %v1773_v43 }
 0x790   : > { %1741 = vmatmul.mubr.f32.vlgmr.msra.gmra.mxu0 %v1630_v32  ;;  %v1623_v34 = vmul.f32 %v2200_v41, %v1615_v33  ;;  %2326 = vmatpush3.msra.mxu1 %v1757_v30  ;;  %v2204_v41 = vld [vmem:[%s3751_s20] ss:$0 sm:$0xff] }
 0x791   : > { %1746 = vmatprep.mubr.f32.mxu0 %v3061_v0  ;;  %v1667_v0 = vshrl.u32 %v1666_v44, 7 }
 0x792   : > { %v1631_v35 = vadd.f32 %v2201_v39, %v1623_v34 }
 0x793   : > { %v1668_v45 = vsub.s32 0, %v1667_v0  ;;  %v1672_v47 = vsub.s32 1, %v1667_v0 }
 0x794   : > { %1747 = vmatmul.mubr.f32.gmra.mxu0 %v1631_v35 }
 0x795   : > { %v1669_v48 = vrot.slane %v1664_v46, %v1668_v45  ;;  %v1673_v49 = vrot.slane %v1664_v46, %v1672_v47 }
 0x850   : > { %v1742_v50 = vpop.f32.mrf.mxu0 }
 0x851   : > { %v1743_v51 = vadd.f32 %v1742_v50, %v1669_v48 }
 0x852   : > { %v1744_v52 = vpop.f32.mrf.mxu0 }
 0x853   : > { %v1745_v53 = vadd.f32 %v1744_v52, %v1673_v49  ;;  %v1753_v56 = vmax.f32 %v1743_v51, 0.0 }
 0x854   : > { %v1748_v54 = vpop.f32.mrf.mxu0 }
 0x855   : > { %v1754_v55 = vmax.f32 %v1745_v53, 0.0  ;;  %v1749_v57 = vadd.f32 %v1748_v54, %v1669_v48 }
 0x856   : > { %v1750_v58 = vpop.f32.mrf.mxu0 }
 0x857   : > { %v1751_v59 = vadd.f32 %v1750_v58, %v1673_v49  ;;  %1860 = vmatprep.mubr.f32.mxu1 %v1754_v55  ;;  %v1755_v61 = vmax.f32 %v1749_v57, 0.0 }
 0x858   : > { %1861 = vmatmul.mubr.f32.vlgmr.msra.gmra.mxu1 %v1753_v56 }
 0x859   : > { %v1756_v60 = vmax.f32 %v1751_v59, 0.0 }
 0x85b   : > { %1865 = vmatprep.mubr.f32.mxu1 %v1756_v60 }
 0x85c   : > { %1866 = vmatmul.mubr.f32.gmra.mxu1 %v1755_v61 }
 0x918   : > { %v2327_v62 = vpop.f32.mrf.mxu1 }
 0x91a   : > { %v2328_v1 = vpop.f32.mrf.mxu1 }
 0x91b   : > { %v2329_v2 = vadd.f32 %v2328_v1, %v2327_v62 }
 0x91c   : > { %v2330_v3 = vpop.f32.mrf.mxu1 }
 0x91d   : > { %v1863_v4 = vadd.f32 %v2329_v2, %v2202_v63 }
 0x91e   : > { %v2331_v5 = vpop.f32.mrf.mxu1 }
 0x91f   : > { %v2332_v6 = vadd.f32 %v2331_v5, %v2330_v3  ;;  %v1871_v7 = vadd.f32 %v1863_v4, %v1630_v32 }
 0x921   : > { %v1868_v8 = vadd.f32 %v2332_v6, %v2202_v63  ;;  %1875 = vadd.xlane.f32.xlu0 %v1871_v7 }
 0x923   : > { %v1872_v9 = vadd.f32 %v1868_v8, %v1631_v35 }
 0x925   : > { %1877 = vadd.xlane.f32.xlu1 %v1872_v9 }
 0x9aa   : > { %v1876_v10 = vpop.xlane.xlu0 %1875 }
 0x9ab   : > { %v1879_v11 = vmul.f32 0.0078125, %v1876_v10 }
 0x9ad   : > { %v1881_v12 = vsub.f32 %v1871_v7, %v1879_v11 }
 0x9ae   : > { %v1878_v13 = vpop.xlane.xlu1 %1877 }
 0x9af   : > { %v1880_v14 = vmul.f32 0.0078125, %v1878_v13  ;;  %v1883_v15 = vmul.f32 %v1881_v12, %v1881_v12 }
 0x9b1   : > { %v1882_v16 = vsub.f32 %v1872_v9, %v1880_v14  ;;  %1885 = vadd.xlane.f32.xlu0 %v1883_v15 }
 0x9b3   : > { %v1884_v17 = vmul.f32 %v1882_v16, %v1882_v16 }
 0x9b5   : > { %1887 = vadd.xlane.f32.xlu1 %v1884_v17 }
 0xa3a   : > { %v1886_v18 = vpop.xlane.xlu0 %1885 }
 0xa3b   : > { %v1889_v19 = vmul.f32 0.0078125, %v1886_v18 }
 0xa3d   : > { %v1891_v20 = vadd.f32 1e-05, %v1889_v19 }
 0xa3e   : > { %v1888_v21 = vpop.xlane.xlu1 %1887 }
 0xa3f   : > { %2664 = vrsqrt.f32 %v1891_v20  ;;  %v1890_v22 = vmul.f32 0.0078125, %v1888_v21 }
 0xa41   : > { %v1892_v23 = vadd.f32 1e-05, %v1890_v22 }
 0xa43   : > { %2666 = vrsqrt.f32 %v1892_v23 }
 0xa4c   : > { %v2665_v24 = vpop.eup %2664 }
 0xa4d   : > { %v1895_v26 = vmul.f32 %v2665_v24, %v1881_v12 }
 0xa4f   : > { %v1903_v27 = vmul.f32 %v2203_v25, %v1895_v26 }
 0xa50   : > { %v2667_v39 = vpop.eup %2666 }
 0xa51   : > { %v1911_v28 = vadd.f32 %v2204_v41, %v1903_v27  ;;  %v1896_v31 = vmul.f32 %v2667_v39, %v1882_v16 }
 0xa53   : > { %v1904_v32 = vmul.f32 %v2203_v25, %v1896_v31  ;;  %1913 = vst [vmem:[%s806_s4] sm:$0xff] %v1911_v28 }
 0xa55   : > { %v1912_v33 = vadd.f32 %v2204_v41, %v1904_v32 }
 0xa57   : > { %1914 = vst [vmem:[%s806_s4 + $0x8] sm:$0xff] %v1912_v33 }
 0xa58   : > { %2973 = shalt.err (!%p2970_p6)
}
 0xa59   : > { %s2974_s26 = scalar_lea.hbm %s3598_s8, 256  ;;  %s2978_s0 = scalar_lea.hbm %s3753_s6, 512 }
 0xa5a   : > { %p2975_p7 = scmp.ne.s32.totalorder %s3598_s8, %s2974_s26  ;;  %p2979_p2 = scmp.lt.s32.totalorder %s3598_s8, %s3753_s6 }
 0xa5b   : > { %p2980_p8 = scmp.lt.s32.totalorder %s2978_s0, %s2974_s26 }
 0xa5c   : > { %p2976_p0 = pnand %p2975_p7, %p3754_p5 }
 0xa5d   : > { %p2981_p4 = por %p2980_p8, %p2979_p2 }
 0xa5e   : > { %p2977_p9 = pneg %p2976_p0 }
 0xa60   : > { %p2982_p11 = pnand %p2981_p4, %p2977_p9 }
 0xa62   : > { %2985 = shalt.err (!%p2982_p11)
}
 0xa63   : > { %s3065_s24 = smov 128   ;;  %s3066_s20 = smov 8  }
 0xa64   : > { %2531 = dma.vmem_to_hbm [thread:$0]  (%p3754_p5), %s3600_s22, 256, %s3598_s8, %s1916_s28, %s3065_s24, %s3065_s24, %s3066_s20  }
 0xa65 PF: > { %s3755_s3 = sld [smem:[#allocation28_spill]]  ;;  %p3758_p12 = scmp.ge.s32.totalorder %s3044_s21, 2 }
 0xa66   : > { %s3756_s4 = sld [smem:[#allocation33_spill]] }
 0xa6b   : > { %s1952_s12 = sand.u32 1, %s3755_s3  }
 0xa6c   : > { %p3757_p13 = scmp.ne.s32.totalorder %s3756_s4, 0  ;;  %s1953_s18 = scalar_lea.sflag [#allocation4], %s1952_s12 }
 0xa6e   : > { %p2569_p1 = pnand %p3758_p12, %p3757_p13 }
 0xa70   : > { %p2570_p10 = pneg %p2569_p1 }
 0xa72   : > { %3027 = dma.done.wait (%p2570_p10), %s1953_s18, 256  }
 0xa73   : > { %3029 = vsyncadd (%p2570_p10), %s1953_s18, 4294967040  ;;  %s3759_s21 = sld [smem:[#allocation30_spill]]  ;;  %s3762_s0 = smov %s3036_s30 }
 0xa74   : > { %s3760_s16 = sld [smem:[#allocation29_spill]] }
 0xa75   : > { %s3761_s20 = sld [smem:[#allocation31_spill]] }
 0xa79   : > { %p40_p3 = scmp.ge.s32.totalorder %s3759_s21, 4  }
 0xa7a   : > { %s3763_s30 = smov %s3760_s16 }
 0xa7b   :  { %42 = sbr.rel (!%p40_p3) target bundleno = 28 (0x1c), region = 206 }
 0xa80   :  { %1966 = vsyncpa [#allocation3], 1 }
 0xa81   :  { %1968 = vsyncpa [#allocation3 + $0x1], 1 }
 0xa82   :  { %1969 = vsyncpa [#allocation6], 1 }
 0xa83   :  { %1971 = vsyncpa [#allocation6 + $0x1], 1 }
 0xa84   :  { %1972 = vsyncpa [#allocation9], 1 }
 0xa85   :  { %1973 = vsyncpa [#allocation12], 1 }
 0xa86   :  { %1974 = vsyncpa [#allocation15], 1 }
 0xa87   :  { %1975 = vsyncpa [#allocation18], 1 }
 0xa88   :  { %1976 = vsyncpa [#allocation4], 1 }
 0xa89   :  { %1978 = vsyncpa [#allocation4 + $0x1], 1 }

</bundles_post_ra>
